<compile_context>
chip_gen: v6e
topology: v6e:2x2x1
jax: 0.10.0
libtpu: 0.0.40
codegen_flags: <defaults>
</compile_context>

<pallas_src>
import jax
import jax.numpy as jnp
from jax.experimental import pallas as pl
from jax.experimental.pallas import tpu as pltpu

LANE = 128  # per-gate lane padding


def gru_last_kernel(x_ref, wih_ref, whh_ref, bgi_ref, bhhn_ref, out_ref, gi_scr):
    """Whole GRU (all timesteps) in a single invocation; writes h_last."""
    S, B, D = x_ref.shape
    LP = whh_ref.shape[0]            # padded hidden width (128)
    H = out_ref.shape[1]             # true hidden width

    # ---- One-time input->hidden pre-activations for every timestep ----------
    # bf16 MXU operands, f32 accumulation; biases (b_ih, + b_hh for r/z) folded.
    x_bf = x_ref[...].reshape(S * B, D).astype(jnp.bfloat16)
    gi_all = jnp.dot(x_bf, wih_ref[...],
                     preferred_element_type=jnp.float32) + bgi_ref[...]
    gi_scr[...] = gi_all.reshape(S, B, 3 * LP)        # time-major VMEM staging

    whh = whh_ref[...]                                # (LP, 3*LP) bf16
    bhhn = jnp.broadcast_to(bhhn_ref[...], (B, LP))   # hoisted out of the loop

    # ---- Recurrence ----------------------------------------------------------
    # Fully unrolled (S small & static). Per step: one bf16 MXU matmul on the
    # serial path + fused whole-tile VPU/EUP gate math. Padding lanes of h are 0
    # forever (zero W_hh rows + zero-padded biases).
    h = jnp.zeros((B, LP), jnp.float32)
    for t in range(S):
        gi = gi_scr[t]                                               # (B, 3*LP)
        gh = jnp.dot(h.astype(jnp.bfloat16), whh,
                     preferred_element_type=jnp.float32)             # (B, 3*LP)
        rz = jax.nn.sigmoid(gi[:, :2 * LP] + gh[:, :2 * LP])         # r & z: 1 EUP push
        r = rz[:, :LP]
        z = rz[:, LP:]
        n = jnp.tanh(gi[:, 2 * LP:] + r * (gh[:, 2 * LP:] + bhhn))
        h = (1.0 - z) * n + z * h

    out_ref[...] = h[:, :H].astype(out_ref.dtype)


def _pad_gate_cols(m, H, LP):
    """(rows, 3H) -> (rows, 3*LP); gate g moved to lanes [g*LP, g*LP + H)."""
    rows = m.shape[0]
    out = jnp.zeros((rows, 3 * LP), m.dtype)
    for g in range(3):
        out = out.at[:, g * LP:g * LP + H].set(m[:, g * H:(g + 1) * H])
    return out


def sentence_embedding_forward(x, w_ih, w_hh, b_ih, b_hh):
    """x: (B, S, D) batch_first; PyTorch-layout GRU params. Returns (B, H)."""
    B, S, D = x.shape
    H = w_hh.shape[1]
    LP = LANE

    # Repack PyTorch params (gate order r, z, n) for the kernel:
    #   W_ih (3H, D) -> (D, 3*LP) bf16
    #   W_hh (3H, H) -> (LP, 3*LP) bf16  (rows H..LP-1 zero: padded h lanes inert)
    #   b_gi = [b_ih_r + b_hh_r, b_ih_z + b_hh_z, b_ih_n] padded to (1, 3*LP)
    #   b_hh_n padded to (1, LP) (must stay inside r * (gh_n + b_hh_n)).
    wih_pad = _pad_gate_cols(jnp.transpose(w_ih).astype(jnp.float32), H, LP)
    wih_pad = wih_pad.astype(jnp.bfloat16)                              # (D, 3LP)

    whh_cols = _pad_gate_cols(jnp.transpose(w_hh).astype(jnp.float32), H, LP)
    whh_pad = jnp.zeros((LP, 3 * LP), jnp.float32).at[:H].set(whh_cols)
    whh_pad = whh_pad.astype(jnp.bfloat16)                              # (LP, 3LP)

    b_gi = jnp.concatenate([b_ih[:2 * H] + b_hh[:2 * H], b_ih[2 * H:]])
    bgi_pad = _pad_gate_cols(b_gi.reshape(1, 3 * H).astype(jnp.float32), H, LP)
    bhhn_pad = jnp.zeros((1, LP), jnp.float32).at[:, :H].set(
        b_hh[2 * H:].reshape(1, H).astype(jnp.float32))

    x_t = jnp.transpose(x, (1, 0, 2))                                   # (S, B, D)

    def vmem_spec():
        return pl.BlockSpec(memory_space=pltpu.MemorySpace.VMEM)

    return pl.pallas_call(
        gru_last_kernel,
        out_shape=jax.ShapeDtypeStruct((B, H), x.dtype),
        in_specs=[vmem_spec() for _ in range(5)],
        out_specs=vmem_spec(),
        scratch_shapes=[pltpu.VMEM((S, B, 3 * LP), jnp.float32)],
    )(x_t, wih_pad, whh_pad, bgi_pad, bhhn_pad)


def gru_reference(x, w_ih, w_hh, b_ih, b_hh):
    """Pure-JAX f32 reference matching torch.nn.GRU (batch_first, 1 layer, unidir)."""
    B, S, D = x.shape
    H = w_hh.shape[1]

    def step(h, x_t):
        gi = x_t @ w_ih.T + b_ih
        gh = h @ w_hh.T + b_hh
        i_r, i_z, i_n = jnp.split(gi, 3, axis=1)
        h_r, h_z, h_n = jnp.split(gh, 3, axis=1)
        r = jax.nn.sigmoid(i_r + h_r)
        z = jax.nn.sigmoid(i_z + h_z)
        n = jnp.tanh(i_n + r * h_n)
        h_new = (1.0 - z) * n + z * h
        return h_new, None

    h0 = jnp.zeros((B, H), jnp.float32)
    h_last, _ = jax.lax.scan(step, h0, jnp.transpose(x, (1, 0, 2)))
    return h_last


if __name__ == "__main__":
    # module config: in_dim=32, num_hid=32, nlayers=1, bidirect=False, rnn_type='GRU'
    B, S, D, H = 2, 8, 32, 32

    key = jax.random.PRNGKey(0)
    k_x, k_wih, k_whh, k_bih, k_bhh = jax.random.split(key, 5)

    bound = 1.0 / jnp.sqrt(H)   # PyTorch GRU default init: U(-1/sqrt(H), 1/sqrt(H))
    x = jax.random.normal(k_x, (B, S, D), dtype=jnp.float32)
    w_ih = jax.random.uniform(k_wih, (3 * H, D), minval=-bound, maxval=bound, dtype=jnp.float32)
    w_hh = jax.random.uniform(k_whh, (3 * H, H), minval=-bound, maxval=bound, dtype=jnp.float32)
    b_ih = jax.random.uniform(k_bih, (3 * H,), minval=-bound, maxval=bound, dtype=jnp.float32)
    b_hh = jax.random.uniform(k_bhh, (3 * H,), minval=-bound, maxval=bound, dtype=jnp.float32)

    out = sentence_embedding_forward(x, w_ih, w_hh, b_ih, b_hh)
    out = jax.block_until_ready(out)

    ref = jax.block_until_ready(gru_reference(x, w_ih, w_hh, b_ih, b_hh))
    assert out.shape == (B, H), out.shape
    # Tolerance relaxed vs. the pure-f32 reference: the kernel feeds the MXU
    # bf16 operands (f32 accumulation) and rounding compounds over S steps.
    assert jnp.allclose(out, ref, rtol=2e-2, atol=2e-2), "mismatch vs JAX GRU reference"

    print("KERNEL_OK")
</pallas_src>

<mosaic_0001>
module attributes {stable_mosaic.version = 11 : i64} {
  func.func @gru_last_kernel(%arg0: memref<8x2x32xf32, #tpu.memory_space<vmem>>, %arg1: memref<32x384xbf16, #tpu.memory_space<vmem>>, %arg2: memref<128x384xbf16, #tpu.memory_space<vmem>>, %arg3: memref<1x384xf32, #tpu.memory_space<vmem>>, %arg4: memref<1x128xf32, #tpu.memory_space<vmem>>, %arg5: memref<2x32xf32, #tpu.memory_space<vmem>>, %arg6: memref<8x2x384xf32, #tpu.memory_space<vmem>>) attributes {dimension_semantics = [], scalar_prefetch = 0 : i64, scratch_operands = 1 : i64, tpu.core_type = #tpu.core_type<tc>} {
    %c0 = arith.constant 0 : index
    %c0_0 = arith.constant 0 : index
    %c0_1 = arith.constant 0 : index
    %0 = vector.load %arg0[%c0, %c0_0, %c0_1] : memref<8x2x32xf32, #tpu.memory_space<vmem>>, vector<8x2x32xf32>
    %1 = vector.shape_cast %0 : vector<8x2x32xf32> to vector<16x32xf32>
    %2 = arith.truncf %1 : vector<16x32xf32> to vector<16x32xbf16>
    %c0_2 = arith.constant 0 : index
    %c0_3 = arith.constant 0 : index
    %3 = vector.load %arg1[%c0_2, %c0_3] : memref<32x384xbf16, #tpu.memory_space<vmem>>, vector<32x384xbf16>
    %cst = arith.constant dense<0.000000e+00> : vector<16x384xf32>
    %4 = tpu.matmul %2, %3, %cst {dimension_numbers = #tpu.dot_dimension_numbers<[1], [0], [0], [1], [0, 0, 1, 1], [], []>} : vector<16x32xbf16>, vector<32x384xbf16>, vector<16x384xf32> -> vector<16x384xf32>
    %c0_4 = arith.constant 0 : index
    %c0_5 = arith.constant 0 : index
    %5 = vector.load %arg3[%c0_4, %c0_5] : memref<1x384xf32, #tpu.memory_space<vmem>>, vector<1x384xf32>
    %6 = vector.broadcast %5 : vector<1x384xf32> to vector<16x384xf32>
    %7 = arith.addf %4, %6 : vector<16x384xf32>
    %8 = vector.shape_cast %7 : vector<16x384xf32> to vector<8x2x384xf32>
    %c0_6 = arith.constant 0 : index
    %c0_7 = arith.constant 0 : index
    %c0_8 = arith.constant 0 : index
    %9 = vector.load %arg6[%c0_6, %c0_7, %c0_8] : memref<8x2x384xf32, #tpu.memory_space<vmem>>, vector<8x2x384xf32>
    tpu.vector_store %arg6[%c0_6, %c0_7, %c0_8], %8 {strides = array<i32>} : memref<8x2x384xf32, #tpu.memory_space<vmem>>, vector<8x2x384xf32>,
    %c0_9 = arith.constant 0 : index
    %c0_10 = arith.constant 0 : index
    %10 = vector.load %arg2[%c0_9, %c0_10] : memref<128x384xbf16, #tpu.memory_space<vmem>>, vector<128x384xbf16>
    %c0_11 = arith.constant 0 : index
    %c0_12 = arith.constant 0 : index
    %11 = vector.load %arg4[%c0_11, %c0_12] : memref<1x128xf32, #tpu.memory_space<vmem>>, vector<1x128xf32>
    %12 = vector.shape_cast %11 : vector<1x128xf32> to vector<1x128xf32>
    %13 = vector.broadcast %12 : vector<1x128xf32> to vector<2x128xf32>
    %cst_13 = arith.constant 0.000000e+00 : f32
    %14 = vector.broadcast %cst_13 : f32 to vector<2x128xf32>
    %c0_14 = arith.constant 0 : index
    %c0_15 = arith.constant 0 : index
    %c0_16 = arith.constant 0 : index
    %15 = vector.load %arg6[%c0_14, %c0_15, %c0_16] : memref<8x2x384xf32, #tpu.memory_space<vmem>>, vector<1x2x384xf32>
    %16 = vector.shape_cast %15 : vector<1x2x384xf32> to vector<2x384xf32>
    %17 = arith.truncf %14 : vector<2x128xf32> to vector<2x128xbf16>
    %cst_17 = arith.constant dense<0.000000e+00> : vector<2x384xf32>
    %18 = tpu.matmul %17, %10, %cst_17 {dimension_numbers = #tpu.dot_dimension_numbers<[1], [0], [0], [1], [0, 0, 1, 1], [], []>} : vector<2x128xbf16>, vector<128x384xbf16>, vector<2x384xf32> -> vector<2x384xf32>
    %19 = vector.extract_strided_slice %16 {offsets = [0, 0], sizes = [2, 256], strides = [1, 1]} : vector<2x384xf32> to vector<2x256xf32>
    %20 = vector.extract_strided_slice %18 {offsets = [0, 0], sizes = [2, 256], strides = [1, 1]} : vector<2x384xf32> to vector<2x256xf32>
    %21 = arith.addf %19, %20 : vector<2x256xf32>
    %22 = arith.negf %21 : vector<2x256xf32>
    %23 = math.exp %22 : vector<2x256xf32>
    %cst_18 = arith.constant 1.000000e+00 : f32
    %24 = vector.broadcast %cst_18 : f32 to vector<2x256xf32>
    %25 = arith.addf %24, %23 : vector<2x256xf32>
    %26 = arith.divf %24, %25 : vector<2x256xf32>
    %27 = vector.extract_strided_slice %26 {offsets = [0, 0], sizes = [2, 128], strides = [1, 1]} : vector<2x256xf32> to vector<2x128xf32>
    %28 = vector.extract_strided_slice %26 {offsets = [0, 128], sizes = [2, 128], strides = [1, 1]} : vector<2x256xf32> to vector<2x128xf32>
    %29 = vector.extract_strided_slice %16 {offsets = [0, 256], sizes = [2, 128], strides = [1, 1]} : vector<2x384xf32> to vector<2x128xf32>
    %30 = vector.extract_strided_slice %18 {offsets = [0, 256], sizes = [2, 128], strides = [1, 1]} : vector<2x384xf32> to vector<2x128xf32>
    %31 = arith.addf %30, %13 : vector<2x128xf32>
    %32 = arith.mulf %27, %31 : vector<2x128xf32>
    %33 = arith.addf %29, %32 : vector<2x128xf32>
    %34 = math.tanh %33 : vector<2x128xf32>
    %cst_19 = arith.constant 1.000000e+00 : f32
    %35 = vector.broadcast %cst_19 : f32 to vector<2x128xf32>
    %36 = arith.subf %35, %28 : vector<2x128xf32>
    %37 = arith.mulf %36, %34 : vector<2x128xf32>
    %38 = arith.mulf %28, %14 : vector<2x128xf32>
    %39 = arith.addf %37, %38 : vector<2x128xf32>
    %c1 = arith.constant 1 : index
    %c0_20 = arith.constant 0 : index
    %c0_21 = arith.constant 0 : index
    %40 = vector.load %arg6[%c1, %c0_20, %c0_21] : memref<8x2x384xf32, #tpu.memory_space<vmem>>, vector<1x2x384xf32>
    %41 = vector.shape_cast %40 : vector<1x2x384xf32> to vector<2x384xf32>
    %42 = arith.truncf %39 : vector<2x128xf32> to vector<2x128xbf16>
    %cst_22 = arith.constant dense<0.000000e+00> : vector<2x384xf32>
    %43 = tpu.matmul %42, %10, %cst_22 {dimension_numbers = #tpu.dot_dimension_numbers<[1], [0], [0], [1], [0, 0, 1, 1], [], []>} : vector<2x128xbf16>, vector<128x384xbf16>, vector<2x384xf32> -> vector<2x384xf32>
    %44 = vector.extract_strided_slice %41 {offsets = [0, 0], sizes = [2, 256], strides = [1, 1]} : vector<2x384xf32> to vector<2x256xf32>
    %45 = vector.extract_strided_slice %43 {offsets = [0, 0], sizes = [2, 256], strides = [1, 1]} : vector<2x384xf32> to vector<2x256xf32>
    %46 = arith.addf %44, %45 : vector<2x256xf32>
    %47 = arith.negf %46 : vector<2x256xf32>
    %48 = math.exp %47 : vector<2x256xf32>
    %cst_23 = arith.constant 1.000000e+00 : f32
    %49 = vector.broadcast %cst_23 : f32 to vector<2x256xf32>
    %50 = arith.addf %49, %48 : vector<2x256xf32>
    %51 = arith.divf %49, %50 : vector<2x256xf32>
    %52 = vector.extract_strided_slice %51 {offsets = [0, 0], sizes = [2, 128], strides = [1, 1]} : vector<2x256xf32> to vector<2x128xf32>
    %53 = vector.extract_strided_slice %51 {offsets = [0, 128], sizes = [2, 128], strides = [1, 1]} : vector<2x256xf32> to vector<2x128xf32>
    %54 = vector.extract_strided_slice %41 {offsets = [0, 256], sizes = [2, 128], strides = [1, 1]} : vector<2x384xf32> to vector<2x128xf32>
    %55 = vector.extract_strided_slice %43 {offsets = [0, 256], sizes = [2, 128], strides = [1, 1]} : vector<2x384xf32> to vector<2x128xf32>
    %56 = arith.addf %55, %13 : vector<2x128xf32>
    %57 = arith.mulf %52, %56 : vector<2x128xf32>
    %58 = arith.addf %54, %57 : vector<2x128xf32>
    %59 = math.tanh %58 : vector<2x128xf32>
    %cst_24 = arith.constant 1.000000e+00 : f32
    %60 = vector.broadcast %cst_24 : f32 to vector<2x128xf32>
    %61 = arith.subf %60, %53 : vector<2x128xf32>
    %62 = arith.mulf %61, %59 : vector<2x128xf32>
    %63 = arith.mulf %53, %39 : vector<2x128xf32>
    %64 = arith.addf %62, %63 : vector<2x128xf32>
    %c2 = arith.constant 2 : index
    %c0_25 = arith.constant 0 : index
    %c0_26 = arith.constant 0 : index
    %65 = vector.load %arg6[%c2, %c0_25, %c0_26] : memref<8x2x384xf32, #tpu.memory_space<vmem>>, vector<1x2x384xf32>
    %66 = vector.shape_cast %65 : vector<1x2x384xf32> to vector<2x384xf32>
    %67 = arith.truncf %64 : vector<2x128xf32> to vector<2x128xbf16>
    %cst_27 = arith.constant dense<0.000000e+00> : vector<2x384xf32>
    %68 = tpu.matmul %67, %10, %cst_27 {dimension_numbers = #tpu.dot_dimension_numbers<[1], [0], [0], [1], [0, 0, 1, 1], [], []>} : vector<2x128xbf16>, vector<128x384xbf16>, vector<2x384xf32> -> vector<2x384xf32>
    %69 = vector.extract_strided_slice %66 {offsets = [0, 0], sizes = [2, 256], strides = [1, 1]} : vector<2x384xf32> to vector<2x256xf32>
    %70 = vector.extract_strided_slice %68 {offsets = [0, 0], sizes = [2, 256], strides = [1, 1]} : vector<2x384xf32> to vector<2x256xf32>
    %71 = arith.addf %69, %70 : vector<2x256xf32>
    %72 = arith.negf %71 : vector<2x256xf32>
    %73 = math.exp %72 : vector<2x256xf32>
    %cst_28 = arith.constant 1.000000e+00 : f32
    %74 = vector.broadcast %cst_28 : f32 to vector<2x256xf32>
    %75 = arith.addf %74, %73 : vector<2x256xf32>
    %76 = arith.divf %74, %75 : vector<2x256xf32>
    %77 = vector.extract_strided_slice %76 {offsets = [0, 0], sizes = [2, 128], strides = [1, 1]} : vector<2x256xf32> to vector<2x128xf32>
    %78 = vector.extract_strided_slice %76 {offsets = [0, 128], sizes = [2, 128], strides = [1, 1]} : vector<2x256xf32> to vector<2x128xf32>
    %79 = vector.extract_strided_slice %66 {offsets = [0, 256], sizes = [2, 128], strides = [1, 1]} : vector<2x384xf32> to vector<2x128xf32>
    %80 = vector.extract_strided_slice %68 {offsets = [0, 256], sizes = [2, 128], strides = [1, 1]} : vector<2x384xf32> to vector<2x128xf32>
    %81 = arith.addf %80, %13 : vector<2x128xf32>
    %82 = arith.mulf %77, %81 : vector<2x128xf32>
    %83 = arith.addf %79, %82 : vector<2x128xf32>
    %84 = math.tanh %83 : vector<2x128xf32>
    %cst_29 = arith.constant 1.000000e+00 : f32
    %85 = vector.broadcast %cst_29 : f32 to vector<2x128xf32>
    %86 = arith.subf %85, %78 : vector<2x128xf32>
    %87 = arith.mulf %86, %84 : vector<2x128xf32>
    %88 = arith.mulf %78, %64 : vector<2x128xf32>
    %89 = arith.addf %87, %88 : vector<2x128xf32>
    %c3 = arith.constant 3 : index
    %c0_30 = arith.constant 0 : index
    %c0_31 = arith.constant 0 : index
    %90 = vector.load %arg6[%c3, %c0_30, %c0_31] : memref<8x2x384xf32, #tpu.memory_space<vmem>>, vector<1x2x384xf32>
    %91 = vector.shape_cast %90 : vector<1x2x384xf32> to vector<2x384xf32>
    %92 = arith.truncf %89 : vector<2x128xf32> to vector<2x128xbf16>
    %cst_32 = arith.constant dense<0.000000e+00> : vector<2x384xf32>
    %93 = tpu.matmul %92, %10, %cst_32 {dimension_numbers = #tpu.dot_dimension_numbers<[1], [0], [0], [1], [0, 0, 1, 1], [], []>} : vector<2x128xbf16>, vector<128x384xbf16>, vector<2x384xf32> -> vector<2x384xf32>
    %94 = vector.extract_strided_slice %91 {offsets = [0, 0], sizes = [2, 256], strides = [1, 1]} : vector<2x384xf32> to vector<2x256xf32>
    %95 = vector.extract_strided_slice %93 {offsets = [0, 0], sizes = [2, 256], strides = [1, 1]} : vector<2x384xf32> to vector<2x256xf32>
    %96 = arith.addf %94, %95 : vector<2x256xf32>
    %97 = arith.negf %96 : vector<2x256xf32>
    %98 = math.exp %97 : vector<2x256xf32>
    %cst_33 = arith.constant 1.000000e+00 : f32
    %99 = vector.broadcast %cst_33 : f32 to vector<2x256xf32>
    %100 = arith.addf %99, %98 : vector<2x256xf32>
    %101 = arith.divf %99, %100 : vector<2x256xf32>
    %102 = vector.extract_strided_slice %101 {offsets = [0, 0], sizes = [2, 128], strides = [1, 1]} : vector<2x256xf32> to vector<2x128xf32>
    %103 = vector.extract_strided_slice %101 {offsets = [0, 128], sizes = [2, 128], strides = [1, 1]} : vector<2x256xf32> to vector<2x128xf32>
    %104 = vector.extract_strided_slice %91 {offsets = [0, 256], sizes = [2, 128], strides = [1, 1]} : vector<2x384xf32> to vector<2x128xf32>
    %105 = vector.extract_strided_slice %93 {offsets = [0, 256], sizes = [2, 128], strides = [1, 1]} : vector<2x384xf32> to vector<2x128xf32>
    %106 = arith.addf %105, %13 : vector<2x128xf32>
    %107 = arith.mulf %102, %106 : vector<2x128xf32>
    %108 = arith.addf %104, %107 : vector<2x128xf32>
    %109 = math.tanh %108 : vector<2x128xf32>
    %cst_34 = arith.constant 1.000000e+00 : f32
    %110 = vector.broadcast %cst_34 : f32 to vector<2x128xf32>
    %111 = arith.subf %110, %103 : vector<2x128xf32>
    %112 = arith.mulf %111, %109 : vector<2x128xf32>
    %113 = arith.mulf %103, %89 : vector<2x128xf32>
    %114 = arith.addf %112, %113 : vector<2x128xf32>
    %c4 = arith.constant 4 : index
    %c0_35 = arith.constant 0 : index
    %c0_36 = arith.constant 0 : index
    %115 = vector.load %arg6[%c4, %c0_35, %c0_36] : memref<8x2x384xf32, #tpu.memory_space<vmem>>, vector<1x2x384xf32>
    %116 = vector.shape_cast %115 : vector<1x2x384xf32> to vector<2x384xf32>
    %117 = arith.truncf %114 : vector<2x128xf32> to vector<2x128xbf16>
    %cst_37 = arith.constant dense<0.000000e+00> : vector<2x384xf32>
    %118 = tpu.matmul %117, %10, %cst_37 {dimension_numbers = #tpu.dot_dimension_numbers<[1], [0], [0], [1], [0, 0, 1, 1], [], []>} : vector<2x128xbf16>, vector<128x384xbf16>, vector<2x384xf32> -> vector<2x384xf32>
    %119 = vector.extract_strided_slice %116 {offsets = [0, 0], sizes = [2, 256], strides = [1, 1]} : vector<2x384xf32> to vector<2x256xf32>
    %120 = vector.extract_strided_slice %118 {offsets = [0, 0], sizes = [2, 256], strides = [1, 1]} : vector<2x384xf32> to vector<2x256xf32>
    %121 = arith.addf %119, %120 : vector<2x256xf32>
    %122 = arith.negf %121 : vector<2x256xf32>
    %123 = math.exp %122 : vector<2x256xf32>
    %cst_38 = arith.constant 1.000000e+00 : f32
    %124 = vector.broadcast %cst_38 : f32 to vector<2x256xf32>
    %125 = arith.addf %124, %123 : vector<2x256xf32>
    %126 = arith.divf %124, %125 : vector<2x256xf32>
    %127 = vector.extract_strided_slice %126 {offsets = [0, 0], sizes = [2, 128], strides = [1, 1]} : vector<2x256xf32> to vector<2x128xf32>
    %128 = vector.extract_strided_slice %126 {offsets = [0, 128], sizes = [2, 128], strides = [1, 1]} : vector<2x256xf32> to vector<2x128xf32>
    %129 = vector.extract_strided_slice %116 {offsets = [0, 256], sizes = [2, 128], strides = [1, 1]} : vector<2x384xf32> to vector<2x128xf32>
    %130 = vector.extract_strided_slice %118 {offsets = [0, 256], sizes = [2, 128], strides = [1, 1]} : vector<2x384xf32> to vector<2x128xf32>
    %131 = arith.addf %130, %13 : vector<2x128xf32>
    %132 = arith.mulf %127, %131 : vector<2x128xf32>
    %133 = arith.addf %129, %132 : vector<2x128xf32>
    %134 = math.tanh %133 : vector<2x128xf32>
    %cst_39 = arith.constant 1.000000e+00 : f32
    %135 = vector.broadcast %cst_39 : f32 to vector<2x128xf32>
    %136 = arith.subf %135, %128 : vector<2x128xf32>
    %137 = arith.mulf %136, %134 : vector<2x128xf32>
    %138 = arith.mulf %128, %114 : vector<2x128xf32>
    %139 = arith.addf %137, %138 : vector<2x128xf32>
    %c5 = arith.constant 5 : index
    %c0_40 = arith.constant 0 : index
    %c0_41 = arith.constant 0 : index
    %140 = vector.load %arg6[%c5, %c0_40, %c0_41] : memref<8x2x384xf32, #tpu.memory_space<vmem>>, vector<1x2x384xf32>
    %141 = vector.shape_cast %140 : vector<1x2x384xf32> to vector<2x384xf32>
    %142 = arith.truncf %139 : vector<2x128xf32> to vector<2x128xbf16>
    %cst_42 = arith.constant dense<0.000000e+00> : vector<2x384xf32>
    %143 = tpu.matmul %142, %10, %cst_42 {dimension_numbers = #tpu.dot_dimension_numbers<[1], [0], [0], [1], [0, 0, 1, 1], [], []>} : vector<2x128xbf16>, vector<128x384xbf16>, vector<2x384xf32> -> vector<2x384xf32>
    %144 = vector.extract_strided_slice %141 {offsets = [0, 0], sizes = [2, 256], strides = [1, 1]} : vector<2x384xf32> to vector<2x256xf32>
    %145 = vector.extract_strided_slice %143 {offsets = [0, 0], sizes = [2, 256], strides = [1, 1]} : vector<2x384xf32> to vector<2x256xf32>
    %146 = arith.addf %144, %145 : vector<2x256xf32>
    %147 = arith.negf %146 : vector<2x256xf32>
    %148 = math.exp %147 : vector<2x256xf32>
    %cst_43 = arith.constant 1.000000e+00 : f32
    %149 = vector.broadcast %cst_43 : f32 to vector<2x256xf32>
    %150 = arith.addf %149, %148 : vector<2x256xf32>
    %151 = arith.divf %149, %150 : vector<2x256xf32>
    %152 = vector.extract_strided_slice %151 {offsets = [0, 0], sizes = [2, 128], strides = [1, 1]} : vector<2x256xf32> to vector<2x128xf32>
    %153 = vector.extract_strided_slice %151 {offsets = [0, 128], sizes = [2, 128], strides = [1, 1]} : vector<2x256xf32> to vector<2x128xf32>
    %154 = vector.extract_strided_slice %141 {offsets = [0, 256], sizes = [2, 128], strides = [1, 1]} : vector<2x384xf32> to vector<2x128xf32>
    %155 = vector.extract_strided_slice %143 {offsets = [0, 256], sizes = [2, 128], strides = [1, 1]} : vector<2x384xf32> to vector<2x128xf32>
    %156 = arith.addf %155, %13 : vector<2x128xf32>
    %157 = arith.mulf %152, %156 : vector<2x128xf32>
    %158 = arith.addf %154, %157 : vector<2x128xf32>
    %159 = math.tanh %158 : vector<2x128xf32>
    %cst_44 = arith.constant 1.000000e+00 : f32
    %160 = vector.broadcast %cst_44 : f32 to vector<2x128xf32>
    %161 = arith.subf %160, %153 : vector<2x128xf32>
    %162 = arith.mulf %161, %159 : vector<2x128xf32>
    %163 = arith.mulf %153, %139 : vector<2x128xf32>
    %164 = arith.addf %162, %163 : vector<2x128xf32>
    %c6 = arith.constant 6 : index
    %c0_45 = arith.constant 0 : index
    %c0_46 = arith.constant 0 : index
    %165 = vector.load %arg6[%c6, %c0_45, %c0_46] : memref<8x2x384xf32, #tpu.memory_space<vmem>>, vector<1x2x384xf32>
    %166 = vector.shape_cast %165 : vector<1x2x384xf32> to vector<2x384xf32>
    %167 = arith.truncf %164 : vector<2x128xf32> to vector<2x128xbf16>
    %cst_47 = arith.constant dense<0.000000e+00> : vector<2x384xf32>
    %168 = tpu.matmul %167, %10, %cst_47 {dimension_numbers = #tpu.dot_dimension_numbers<[1], [0], [0], [1], [0, 0, 1, 1], [], []>} : vector<2x128xbf16>, vector<128x384xbf16>, vector<2x384xf32> -> vector<2x384xf32>
    %169 = vector.extract_strided_slice %166 {offsets = [0, 0], sizes = [2, 256], strides = [1, 1]} : vector<2x384xf32> to vector<2x256xf32>
    %170 = vector.extract_strided_slice %168 {offsets = [0, 0], sizes = [2, 256], strides = [1, 1]} : vector<2x384xf32> to vector<2x256xf32>
    %171 = arith.addf %169, %170 : vector<2x256xf32>
    %172 = arith.negf %171 : vector<2x256xf32>
    %173 = math.exp %172 : vector<2x256xf32>
    %cst_48 = arith.constant 1.000000e+00 : f32
    %174 = vector.broadcast %cst_48 : f32 to vector<2x256xf32>
    %175 = arith.addf %174, %173 : vector<2x256xf32>
    %176 = arith.divf %174, %175 : vector<2x256xf32>
    %177 = vector.extract_strided_slice %176 {offsets = [0, 0], sizes = [2, 128], strides = [1, 1]} : vector<2x256xf32> to vector<2x128xf32>
    %178 = vector.extract_strided_slice %176 {offsets = [0, 128], sizes = [2, 128], strides = [1, 1]} : vector<2x256xf32> to vector<2x128xf32>
    %179 = vector.extract_strided_slice %166 {offsets = [0, 256], sizes = [2, 128], strides = [1, 1]} : vector<2x384xf32> to vector<2x128xf32>
    %180 = vector.extract_strided_slice %168 {offsets = [0, 256], sizes = [2, 128], strides = [1, 1]} : vector<2x384xf32> to vector<2x128xf32>
    %181 = arith.addf %180, %13 : vector<2x128xf32>
    %182 = arith.mulf %177, %181 : vector<2x128xf32>
    %183 = arith.addf %179, %182 : vector<2x128xf32>
    %184 = math.tanh %183 : vector<2x128xf32>
    %cst_49 = arith.constant 1.000000e+00 : f32
    %185 = vector.broadcast %cst_49 : f32 to vector<2x128xf32>
    %186 = arith.subf %185, %178 : vector<2x128xf32>
    %187 = arith.mulf %186, %184 : vector<2x128xf32>
    %188 = arith.mulf %178, %164 : vector<2x128xf32>
    %189 = arith.addf %187, %188 : vector<2x128xf32>
    %c7 = arith.constant 7 : index
    %c0_50 = arith.constant 0 : index
    %c0_51 = arith.constant 0 : index
    %190 = vector.load %arg6[%c7, %c0_50, %c0_51] : memref<8x2x384xf32, #tpu.memory_space<vmem>>, vector<1x2x384xf32>
    %191 = vector.shape_cast %190 : vector<1x2x384xf32> to vector<2x384xf32>
    %192 = arith.truncf %189 : vector<2x128xf32> to vector<2x128xbf16>
    %cst_52 = arith.constant dense<0.000000e+00> : vector<2x384xf32>
    %193 = tpu.matmul %192, %10, %cst_52 {dimension_numbers = #tpu.dot_dimension_numbers<[1], [0], [0], [1], [0, 0, 1, 1], [], []>} : vector<2x128xbf16>, vector<128x384xbf16>, vector<2x384xf32> -> vector<2x384xf32>
    %194 = vector.extract_strided_slice %191 {offsets = [0, 0], sizes = [2, 256], strides = [1, 1]} : vector<2x384xf32> to vector<2x256xf32>
    %195 = vector.extract_strided_slice %193 {offsets = [0, 0], sizes = [2, 256], strides = [1, 1]} : vector<2x384xf32> to vector<2x256xf32>
    %196 = arith.addf %194, %195 : vector<2x256xf32>
    %197 = arith.negf %196 : vector<2x256xf32>
    %198 = math.exp %197 : vector<2x256xf32>
    %cst_53 = arith.constant 1.000000e+00 : f32
    %199 = vector.broadcast %cst_53 : f32 to vector<2x256xf32>
    %200 = arith.addf %199, %198 : vector<2x256xf32>
    %201 = arith.divf %199, %200 : vector<2x256xf32>
    %202 = vector.extract_strided_slice %201 {offsets = [0, 0], sizes = [2, 128], strides = [1, 1]} : vector<2x256xf32> to vector<2x128xf32>
    %203 = vector.extract_strided_slice %201 {offsets = [0, 128], sizes = [2, 128], strides = [1, 1]} : vector<2x256xf32> to vector<2x128xf32>
    %204 = vector.extract_strided_slice %191 {offsets = [0, 256], sizes = [2, 128], strides = [1, 1]} : vector<2x384xf32> to vector<2x128xf32>
    %205 = vector.extract_strided_slice %193 {offsets = [0, 256], sizes = [2, 128], strides = [1, 1]} : vector<2x384xf32> to vector<2x128xf32>
    %206 = arith.addf %205, %13 : vector<2x128xf32>
    %207 = arith.mulf %202, %206 : vector<2x128xf32>
    %208 = arith.addf %204, %207 : vector<2x128xf32>
    %209 = math.tanh %208 : vector<2x128xf32>
    %cst_54 = arith.constant 1.000000e+00 : f32
    %210 = vector.broadcast %cst_54 : f32 to vector<2x128xf32>
    %211 = arith.subf %210, %203 : vector<2x128xf32>
    %212 = arith.mulf %211, %209 : vector<2x128xf32>
    %213 = arith.mulf %203, %189 : vector<2x128xf32>
    %214 = arith.addf %212, %213 : vector<2x128xf32>
    %215 = vector.extract_strided_slice %214 {offsets = [0, 0], sizes = [2, 32], strides = [1, 1]} : vector<2x128xf32> to vector<2x32xf32>
    %c0_55 = arith.constant 0 : index
    %c0_56 = arith.constant 0 : index
    %216 = vector.load %arg5[%c0_55, %c0_56] : memref<2x32xf32, #tpu.memory_space<vmem>>, vector<2x32xf32>
    tpu.vector_store %arg5[%c0_55, %c0_56], %215 {strides = array<i32>} : memref<2x32xf32, #tpu.memory_space<vmem>>, vector<2x32xf32>,
    return
  }
}

</mosaic_0001>

<bundles_post_ra>
// kernel: tpu_custom_call.1
= control target key start
LH: loop header
LB: loop body
LE: loop exit
PB: predicated region body
PF: predicated region fallthrough
CT: control target
= control target key end

     0   :  { %10 = vsyncpa [#allocation4], 0  ;;  %s2397_s0 = inlined_call_operand.hbm [shape: f32[8,2,32], index: 0, kind: input, shape index: {}]   ;;  %s2398_s1 = inlined_call_operand.hbm [shape: bf16[32,384], index: 1, kind: input, shape index: {}]   ;;  %s2399_s2 = inlined_call_operand.hbm [shape: bf16[128,384], index: 2, kind: input, shape index: {}]   ;;  %s2400_s3 = inlined_call_operand.vmem [shape: f32[1,384], index: 3, kind: input, shape index: {}]   ;;  %s2401_s4 = inlined_call_operand.vmem [shape: f32[1,128], index: 4, kind: input, shape index: {}]   ;;  %s2402_s5 = inlined_call_operand.hbm [shape: f32[2,32], index: 5, kind: output, shape index: {}]  }
   0x1   :  { %11 = vsyncpa [#allocation7], 0 }
   0x2   :  { %12 = vsyncpa [#allocation5], 0  ;;  %s1943_s18 = smov [#allocation6]  }
   0x3   :  { %s30_s19 = sshll.u32 %s1943_s18, 4  ;;  %s31_s19 = int_to_ptr.vmem [resolvable:$true] %s30_s19 }
   0x4   :  { %s1865_s20 = scalar_lea.vmem %s31_s19, 768  ;;  %p1870_p1 = scmp.lt.s32.totalorder %s31_s19, %s31_s19 }
   0x5   :  { %p1866_p0 = scmp.ne.s32.totalorder %s31_s19, %s1865_s20  ;;  %p1871_p2 = scmp.lt.s32.totalorder %s1865_s20, %s1865_s20 }
   0x7   :  { %p1872_p3 = por %p1871_p2, %p1870_p1 }
   0x9   :  { %p1873_p4 = pnand %p1872_p3, %p1866_p0 }
   0xb   :  { %1876 = shalt.err (!%p1873_p4)
}
   0xc   :  { %s1944_s21 = smov 192   ;;  %s1945_s22 = smov 12  }
   0xd   :  { %36 = dma.hbm_to_vmem [thread:$0]  %s2398_s1, 768, %s31_s19, [#allocation7], %s1944_s21, %s1944_s21, %s1945_s22  }
   0xe   :  { %s1946_s25 = smov [#allocation3]  }
   0xf   :  { %s18_s26 = sshll.u32 %s1946_s25, 4  ;;  %s19_s26 = int_to_ptr.vmem [resolvable:$true] %s18_s26 }
  0x10   :  { %s1885_s27 = scalar_lea.vmem %s19_s26, 256  ;;  %p1890_p6 = scmp.lt.s32.totalorder %s19_s26, %s19_s26 }
  0x11   :  { %p1886_p5 = scmp.ne.s32.totalorder %s19_s26, %s1885_s27  ;;  %p1891_p7 = scmp.lt.s32.totalorder %s1885_s27, %s1885_s27 }
  0x13   :  { %p1892_p8 = por %p1891_p7, %p1890_p6 }
  0x15   :  { %p1893_p9 = pnand %p1892_p8, %p1886_p5 }
  0x17   :  { %1896 = shalt.err (!%p1893_p9)
}
  0x18   :  { %s1947_s28 = smov 32   ;;  %s1948_s29 = smov 2  }
  0x19   :  { %24 = dma.hbm_to_vmem [thread:$0]  %s2397_s0, 256, %s19_s26, [#allocation4], %s1947_s28, %s1947_s28, %s1948_s29  }
  0x1a   :  { %s1949_s7 = smov [#allocation8]  }
  0x1b   :  { %s42_s8 = sshll.u32 %s1949_s7, 4  ;;  %s43_s8 = int_to_ptr.vmem [resolvable:$true] %s42_s8 }
  0x1c   :  { %s1905_s1 = scalar_lea.vmem %s43_s8, 3072  ;;  %p1910_p11 = scmp.lt.s32.totalorder %s43_s8, %s43_s8 }
  0x1d   :  { %p1906_p10 = scmp.ne.s32.totalorder %s43_s8, %s1905_s1  ;;  %p1911_p12 = scmp.lt.s32.totalorder %s1905_s1, %s1905_s1 }
  0x1f   :  { %p1912_p13 = por %p1911_p12, %p1910_p11 }
  0x21   :  { %p1913_p0 = pnand %p1912_p13, %p1906_p10 }
  0x23   :  { %1916 = shalt.err (!%p1913_p0)
}
  0x24   :  { %48 = dma.hbm_to_vmem [thread:$0]  %s2399_s2, 3072, %s43_s8, [#allocation7], %s1944_s21, %s1944_s21, %s1945_s22  }
  0x25   :  { %1937 = dma.done.wait [#allocation4], 256  }
  0x26   :  { %1938 = vsyncadd [#allocation4], 4294967040 }
  0x27   :  { %1939 = dma.done.wait [#allocation7], 3840  }
  0x28   :  { %1940 = vsyncadd [#allocation7], 4294963456  ;;  %v1950_v0 = vmov 0.0   ;;  %v1951_v1 = vmov 0   ;;  %vm1952_vm0 = vmmov 0   ;;  %v84_v4 = vlaneseq }
  0x29   :  { %1580 = vmatprep.subr.bf16.mxu1 %v1950_v0  ;;  %209 = vmatprep.mubr.bf16.mxu0 %v1951_v1  ;;  %v1953_v2 = vmov 1983009808   ;;  %v1760_v5 = vld [vmem:[#allocation6 + $0x1c] ss:$12 sps:$4 sm:$0xff]   ;;  %v1762_v8 = vld [vmem:[#allocation6 + $0x18] ss:$12 sps:$4 sm:$0xff]  }
  0x2a   :  { %1584 = vmatprep.mubr.msk.bf16.mxu1 %vm1952_vm0, %v1950_v0  ;;  %v82_v3 = vunpack.c.l.s4 %v1953_v2  ;;  %v1998_v7 = vshrl.u32 %v84_v4, 7  ;;  %189 = vmatprep.subr.bf16.mxu0 %v1760_v5  ;;  %v1763_v9 = vld [vmem:[#allocation6 + $0x20] ss:$12 sps:$4 sm:$0xff]   ;;  %v1764_v10 = vld [vmem:[#allocation6 + $0x4] ss:$12 sps:$4 sm:$0xff]   ;;  %vm173_vm1 = vcmask 261120  }
  0x2b   :  { %190 = vmatpush1.bf16.msra.mxu0 %v1762_v8  ;;  %v1766_v11 = vld [vmem:[#allocation6] ss:$12 sps:$4 sm:$0xff]   ;;  %1581 = vmatpush3.bf16.msra.mxu1 %v1763_v9  ;;  %v1767_v12 = vld [vmem:[#allocation6 + $0x8] ss:$12 sps:$4 sm:$0xff]   ;;  %v63_v13 = vld [vmem:[#allocation3] sm:$0x3] }
  0x2c   :  { %v83_v6 = vunpack.c.0.s8 %v82_v3  ;;  %191 = vmatprep.subr.bf16.mxu0 %v1764_v10  ;;  %1582 = vmatprep.subr.bf16.mxu1 %v1950_v0  ;;  %v64_v15 = vld [vmem:[#allocation3 + $0x2] sm:$0x3]  ;;  %v65_v16 = vld [vmem:[#allocation3 + $0x4] sm:$0x3]  ;;  %v66_v17 = vld [vmem:[#allocation3 + $0x6] sm:$0x3] }
  0x2d   :  { %v67_v18 = vld [vmem:[#allocation3 + $0x8] sm:$0x3]  ;;  %v68_v19 = vld [vmem:[#allocation3 + $0xa] sm:$0x3]  ;;  %v69_v20 = vld [vmem:[#allocation3 + $0xc] sm:$0x3]  ;;  %v79_v21 = vcombine.low %v63_v13, %v64_v15  ;;  %v80_v22 = vcombine.low %v65_v16, %v66_v17 }
  0x2e   :  { %v2001_v14 = vsub.s32 %v83_v6, %v1998_v7  ;;  %v70_v23 = vld [vmem:[#allocation3 + $0xe] sm:$0x3]  ;;  %v96_v24 = vcombine.low %v67_v18, %v68_v19  ;;  %v2012_v33 = vld [vmem:[#allocation8 + $0xa8] ss:$12 sps:$4 sm:$0xff]   ;;  %v2017_v36 = vld [vmem:[#allocation8 + $0x90] ss:$12 sps:$4 sm:$0xff]  }
  0x2f   :  { %192 = vmatpush1.bf16.msra.mxu0 %v1766_v11  ;;  %1583 = vmatpush3.bf16.msra.mxu1 %v1767_v12  ;;  %v97_v27 = vcombine.low %v69_v20, %v70_v23  ;;  %v2006_v28 = vld [vmem:[#allocation8 + $0xac] ss:$12 sps:$4 sm:$0xff]   ;;  %v2014_v35 = vld [vmem:[#allocation8 + $0x94] ss:$12 sps:$4 sm:$0xff]   ;;  %v2019_v37 = vld [vmem:[#allocation8 + $0x7c] ss:$12 sps:$4 sm:$0xff]  }
  0x30   :  { %v87_v25 = vrot.slane %v79_v21, %v2001_v14  ;;  %v94_v26 = vrot.slane %v80_v22, %v2001_v14  ;;  %v104_v29 = vrot.slane %v96_v24, %v2001_v14  ;;  %1588 = vmatprep.subr.bf16.mxu1 %v1950_v0  ;;  %521 = vmatprep.subr.bf16.mxu0 %v2006_v28  ;;  %v2023_v38 = vld [vmem:[#allocation8 + $0xb0] ss:$12 sps:$4 sm:$0xff]   ;;  %v2028_v39 = vld [vmem:[#allocation8 + $0x98] ss:$12 sps:$4 sm:$0xff]   ;;  %v2038_v42 = vld [vmem:[#allocation8 + $0x80] ss:$12 sps:$4 sm:$0xff]  }
  0x31   :  { %v111_v31 = vrot.slane %v97_v27, %v2001_v14  ;;  %v2031_v40 = vld [vmem:[#allocation8 + $0x78] ss:$12 sps:$4 sm:$0xff]   ;;  %v2041_v43 = vld [vmem:[#allocation8 + $0x60] ss:$12 sps:$4 sm:$0xff]   ;;  %v2048_v45 = vld [vmem:[#allocation8 + $0x68] ss:$12 sps:$4 sm:$0xff]  }
  0x32   :  { %v95_v30 = vcombine.low %v87_v25, %v94_v26  ;;  %v2035_v41 = vld [vmem:[#allocation8 + $0x64] ss:$12 sps:$4 sm:$0xff]   ;;  %v2045_v44 = vld [vmem:[#allocation8 + $0x4c] ss:$12 sps:$4 sm:$0xff]   ;;  %v2051_v46 = vld [vmem:[#allocation8 + $0x48] ss:$12 sps:$4 sm:$0xff]  }
  0x33   :  { %v112_v32 = vcombine.low %v104_v29, %v111_v31  ;;  %v2055_v47 = vld [vmem:[#allocation8 + $0x34] ss:$12 sps:$4 sm:$0xff]   ;;  %v2058_v48 = vld [vmem:[#allocation8 + $0x50] ss:$12 sps:$4 sm:$0xff]   ;;  %v2068_v51 = vld [vmem:[#allocation8 + $0x38] ss:$12 sps:$4 sm:$0xff]  }
  0x34   :  { %v2061_v49 = vld [vmem:[#allocation8 + $0x30] ss:$12 sps:$4 sm:$0xff]   ;;  %v2071_v52 = vld [vmem:[#allocation8 + $0x18] ss:$12 sps:$4 sm:$0xff]   ;;  %v2078_v54 = vld [vmem:[#allocation8 + $0x20] ss:$12 sps:$4 sm:$0xff]  }
  0x35   :  { %v115_v34 = vpack.c.bf16 %v112_v32, %v95_v30  ;;  %v2065_v50 = vld [vmem:[#allocation8 + $0x1c] ss:$12 sps:$4 sm:$0xff]   ;;  %v2075_v53 = vld [vmem:[#allocation8 + $0x4] ss:$12 sps:$4 sm:$0xff]   ;;  %v2081_v55 = vld [vmem:[#allocation8] ss:$12 sps:$4 sm:$0xff]  }
  0x36   :  { %v2086_v56 = vld [vmem:[#allocation8 + $0x8] ss:$12 sps:$4 sm:$0xff]   ;;  %v128_v57 = vsub.s32 0, %v1998_v7  ;;  %v136_v58 = vsub.s32 2, %v1998_v7  ;;  %v124_v59 = vld [vmem:[%s2400_s3] sm:$0x7] }
  0x37   :  { %1470 = vmatmul.mubr.msk.bf16.vlgmr.msra.gmra.mxu0 %vm173_vm1, %v115_v34  ;;  %1585 = vmatmul.mubr.msk.bf16.vlgmr.msra.gmra.mxu1 %vm173_vm1, %v115_v34  ;;  %v132_v60 = vsub.s32 1, %v1998_v7  ;;  %vm1446_vm2 = vcmask 254976  }
  0x38   :  { %522 = vmatpush1.bf16.msra.mxu0 %v2012_v33  ;;  %553 = vmatprep.mubr.bf16.mxu0 %v1951_v1  ;;  %v129_v61 = vrot.slane %v124_v59, %v128_v57  ;;  %v137_v62 = vrot.slane %v124_v59, %v136_v58 }
  0x39   :  { %523 = vmatprep.subr.bf16.mxu0 %v2014_v35  ;;  %1604 = vmatprep.mubr.msk.bf16.mxu1 %vm1952_vm0, %v1950_v0  ;;  %v133_v63 = vrot.slane %v124_v59, %v132_v60 }
  0x3a   :  { %1589 = vmatpush3.bf16.msra.mxu1 %v2023_v38 }
  0x3b   :  { %1590 = vmatprep.subr.bf16.mxu1 %v1950_v0 }
  0x3c   :  { %524 = vmatpush1.bf16.msra.mxu0 %v2017_v36 }
  0x3d   :  { %525 = vmatprep.subr.bf16.mxu0 %v2019_v37 }
  0x3e   :  { %1591 = vmatpush3.bf16.msra.mxu1 %v2028_v39 }
  0x3f   :  { %1592 = vmatprep.subr.bf16.mxu1 %v1950_v0 }
  0x40   :  { %526 = vmatpush1.bf16.msra.mxu0 %v2031_v40 }
  0x41   :  { %527 = vmatprep.subr.bf16.mxu0 %v2035_v41 }
  0x42   :  { %1593 = vmatpush3.bf16.msra.mxu1 %v2038_v42 }
  0x43   :  { %1594 = vmatprep.subr.bf16.mxu1 %v1950_v0 }
  0x44   :  { %528 = vmatpush1.bf16.msra.mxu0 %v2041_v43 }
  0x45   :  { %529 = vmatprep.subr.bf16.mxu0 %v2045_v44 }
  0x46   :  { %1595 = vmatpush3.bf16.msra.mxu1 %v2048_v45 }
  0x47   :  { %1596 = vmatprep.subr.bf16.mxu1 %v1950_v0 }
  0x48   :  { %530 = vmatpush1.bf16.msra.mxu0 %v2051_v46 }
  0x49   :  { %531 = vmatprep.subr.bf16.mxu0 %v2055_v47 }
  0x4a   :  { %1597 = vmatpush3.bf16.msra.mxu1 %v2058_v48 }
  0x4b   :  { %1598 = vmatprep.subr.bf16.mxu1 %v1950_v0 }
  0x4c   :  { %532 = vmatpush1.bf16.msra.mxu0 %v2061_v49 }
  0x4d   :  { %533 = vmatprep.subr.bf16.mxu0 %v2065_v50 }
  0x4e   :  { %1599 = vmatpush3.bf16.msra.mxu1 %v2068_v51 }
  0x4f   :  { %1600 = vmatprep.subr.bf16.mxu1 %v1950_v0 }
  0x50   :  { %534 = vmatpush1.bf16.msra.mxu0 %v2071_v52 }
  0x51   :  { %535 = vmatprep.subr.bf16.mxu0 %v2075_v53 }
  0x52   :  { %1601 = vmatpush3.bf16.msra.mxu1 %v2078_v54 }
  0x53   :  { %1602 = vmatprep.subr.bf16.mxu1 %v1950_v0 }
  0x54   :  { %536 = vmatpush1.bf16.msra.mxu0 %v2081_v55 }
  0x55   :  { %637 = vmatprep.subr.bf16.mxu0 %v2006_v28 }
  0x56   :  { %1603 = vmatpush3.bf16.msra.mxu1 %v2086_v56 }
  0x57   :  { %554 = vmatmul.mubr.bf16.vlgmr.msra.gmra.mxu0 %v1951_v1  ;;  %1608 = vmatprep.subr.bf16.mxu1 %v1950_v0 }
  0x58   :  { %638 = vmatpush1.bf16.msra.mxu0 %v2012_v33  ;;  %669 = vmatprep.mubr.bf16.mxu0 %v1951_v1 }
  0x59   :  { %639 = vmatprep.subr.bf16.mxu0 %v2014_v35  ;;  %1605 = vmatmul.mubr.bf16.vlgmr.msra.gmra.mxu1 %v1951_v1 }
  0x5a   :  { %1609 = vmatpush3.bf16.msra.mxu1 %v2023_v38  ;;  %1624 = vmatprep.mubr.msk.bf16.mxu1 %vm1952_vm0, %v1950_v0 }
  0x5b   :  { %1610 = vmatprep.subr.bf16.mxu1 %v1950_v0 }
  0x5c   :  { %640 = vmatpush1.bf16.msra.mxu0 %v2017_v36 }
  0x5d   :  { %641 = vmatprep.subr.bf16.mxu0 %v2019_v37 }
  0x5e   :  { %1611 = vmatpush3.bf16.msra.mxu1 %v2028_v39 }
  0x5f   :  { %1612 = vmatprep.subr.bf16.mxu1 %v1950_v0 }
  0x60   :  { %642 = vmatpush1.bf16.msra.mxu0 %v2031_v40 }
  0x61   :  { %643 = vmatprep.subr.bf16.mxu0 %v2035_v41 }
  0x62   :  { %1613 = vmatpush3.bf16.msra.mxu1 %v2038_v42 }
  0x63   :  { %1614 = vmatprep.subr.bf16.mxu1 %v1950_v0 }
  0x64   :  { %644 = vmatpush1.bf16.msra.mxu0 %v2041_v43 }
  0x65   :  { %645 = vmatprep.subr.bf16.mxu0 %v2045_v44 }
  0x66   :  { %1615 = vmatpush3.bf16.msra.mxu1 %v2048_v45 }
  0x67   :  { %1616 = vmatprep.subr.bf16.mxu1 %v1950_v0 }
  0x68   :  { %646 = vmatpush1.bf16.msra.mxu0 %v2051_v46 }
  0x69   :  { %647 = vmatprep.subr.bf16.mxu0 %v2055_v47 }
  0x6a   :  { %1617 = vmatpush3.bf16.msra.mxu1 %v2058_v48 }
  0x6b   :  { %1618 = vmatprep.subr.bf16.mxu1 %v1950_v0 }
  0x6c   :  { %648 = vmatpush1.bf16.msra.mxu0 %v2061_v49 }
  0x6d   :  { %649 = vmatprep.subr.bf16.mxu0 %v2065_v50 }
  0x6e   :  { %1619 = vmatpush3.bf16.msra.mxu1 %v2068_v51 }
  0x6f   :  { %1620 = vmatprep.subr.bf16.mxu1 %v1950_v0 }
  0x70   :  { %650 = vmatpush1.bf16.msra.mxu0 %v2071_v52 }
  0x71   :  { %651 = vmatprep.subr.bf16.mxu0 %v2075_v53 }
  0x72   :  { %1621 = vmatpush3.bf16.msra.mxu1 %v2078_v54 }
  0x73   :  { %1622 = vmatprep.subr.bf16.mxu1 %v1950_v0 }
  0x74   :  { %652 = vmatpush1.bf16.msra.mxu0 %v2081_v55 }
  0x75   :  { %753 = vmatprep.subr.bf16.mxu0 %v2006_v28 }
  0x76   :  { %1623 = vmatpush3.bf16.msra.mxu1 %v2086_v56 }
  0x77   :  { %1628 = vmatprep.subr.bf16.mxu1 %v1950_v0 }
  0xf7   :  { %v211_v2 = vpop.f32.mrf.mxu0  ;;  %v254_v3 = vpop.f32.mrf.mxu1 }
  0xf8   :  { %v212_v4 = vadd.f32 %v211_v2, %v129_v61  ;;  %v255_v5 = vadd.f32 %v254_v3, %v137_v62 }
  0xf9   :  { %v213_v6 = vpop.f32.mrf.mxu0  ;;  %v1586_v8 = vpop.f32.mrf.mxu1 }
  0xfa   :  { %v214_v9 = vadd.f32 %v213_v6, %v133_v63  ;;  %v269_v10 = vcombine.high %v255_v5, %v255_v5  ;;  %v290_v16 = vrot.slane %v255_v5, %v2001_v14 }
  0xfb   :  { %v215_v11 = vpop.f32.mrf.mxu0  ;;  %v257_v12 = vpop.f32.mrf.mxu1 }
  0xfc   :  { %v267_v13 = vcombine.low %v212_v4, %v214_v9  ;;  %v268_v15 = vcombine.high %v212_v4, %v214_v9  ;;  %v297_v17 = vrot.slane %v269_v10, %v2001_v14  ;;  %v258_v18 = vadd.f32 %v257_v12, %v137_v62 }
  0xfd   :  { %v217_v7 = vpop.f32.mrf.mxu0  ;;  %v1587_v19 = vpop.f32.mrf.mxu1  ;;  %v216_v23 = vadd.f32 %v215_v11, %v129_v61 }
  0xfe   :  { %v276_v20 = vrot.slane %v267_v13, %v2001_v14  ;;  %v283_v21 = vrot.slane %v268_v15, %v2001_v14  ;;  %v218_v22 = vadd.f32 %v217_v7, %v133_v63  ;;  %v304_v24 = vcombine.high %v258_v18, %v258_v18  ;;  %v2148_v7 = vld [vmem:[%s2401_s4] ss:$0 sm:$0xff]  ;;  %s1954_s4 = smov [#allocation9]  }
  0xff   :  { %v325_v32 = vrot.slane %v258_v18, %v2001_v14  ;;  %s1454_s12 = sshll.u32 %s1954_s4, 4  ;;  %s1455_s12 = int_to_ptr.vmem [resolvable:$true] %s1454_s12 }
 0x100   :  { %v298_v25 = vcombine.low %v276_v20, %v290_v16  ;;  %v299_v26 = vcombine.high %v276_v20, %v290_v16  ;;  %v300_v27 = vcombine.low %v283_v21, %v297_v17  ;;  %v301_v29 = vcombine.high %v283_v21, %v297_v17  ;;  %s1917_s13 = scalar_lea.vmem %s1455_s12, 32  ;;  %p1922_p2 = scmp.lt.s32.totalorder %s1455_s12, %s1455_s12 }
 0x101   :  { %v302_v30 = vcombine.low %v216_v23, %v218_v22  ;;  %v303_v31 = vcombine.high %v216_v23, %v218_v22  ;;  %v332_v34 = vrot.slane %v304_v24, %v2001_v14  ;;  %p1918_p1 = scmp.ne.s32.totalorder %s1455_s12, %s1917_s13  ;;  %p1923_p3 = scmp.lt.s32.totalorder %s1917_s13, %s1917_s13 }
 0x102   :  { %345 = vst [vmem:[#allocation2] sm:$0x3f] %v298_v25  ;;  %346 = vst [vmem:[#allocation2 + $0x6] sm:$0x3f] %v299_v26 }
 0x103   :  { %347 = vst [vmem:[#allocation2 + $0xc] sm:$0x3f] %v300_v27  ;;  %348 = vst [vmem:[#allocation2 + $0x12] sm:$0x3f] %v301_v29  ;;  %v311_v57 = vrot.slane %v302_v30, %v2001_v14  ;;  %v318_v58 = vrot.slane %v303_v31, %v2001_v14  ;;  %p1924_p4 = por %p1923_p3, %p1922_p2 }
 0x105   :  { %v333_v59 = vcombine.low %v311_v57, %v325_v32  ;;  %v334_v60 = vcombine.high %v311_v57, %v325_v32  ;;  %v335_v61 = vcombine.low %v318_v58, %v332_v34  ;;  %v336_v62 = vcombine.high %v318_v58, %v332_v34  ;;  %p1925_p5 = pnand %p1924_p4, %p1918_p1 }
 0x107   :  { %349 = vst [vmem:[#allocation2 + $0x18] sm:$0x3f] %v333_v59  ;;  %350 = vst [vmem:[#allocation2 + $0x1e] sm:$0x3f] %v334_v60 }
 0x108   :  { %351 = vst [vmem:[#allocation2 + $0x24] sm:$0x3f] %v335_v61  ;;  %352 = vst [vmem:[#allocation2 + $0x2a] sm:$0x3f] %v336_v62 }
 0x109   :  { %v392_v9 = vld [vmem:[#allocation2] sm:$0x3f]  ;;  %v635_v62 = vld [vmem:[#allocation2 + $0x6] sm:$0x3f] }
 0x10a   :  { %v623_v21 = vrot.slane %v392_v9, 4 }
 0x117   :  { %v555_v63 = vpop.f32.mrf.mxu0 }
 0x119   :  { %v557_v2 = vpop.f32.mrf.mxu0  ;;  %v596_v4 = vpop.f32.mrf.mxu1 }
 0x11a   :  { %v604_v3 = vcombine.low %v555_v63, %v557_v2  ;;  %v620_v18 = vadd.f32 %v2148_v7, %v596_v4 }
 0x11b   :  { %v559_v5 = vpop.f32.mrf.mxu0  ;;  %v1606_v8 = vpop.f32.mrf.mxu1 }
 0x11c   :  { %v611_v6 = vrot.slane %v604_v3, %v2001_v14 }
 0x11d   :  { %v560_v10 = vpop.f32.mrf.mxu0  ;;  %v599_v12 = vpop.f32.mrf.mxu1 }
 0x11e   :  { %v613_v11 = vadd.f32 %v611_v6, %v392_v9 }
 0x11f   :  { %v1607_v15 = vpop.f32.mrf.mxu1 }
 0x120   :  { %v1497_v13 = vmul.f32 -1.442695, %v613_v11  ;;  %v739_v11 = vrot.slane %v635_v62, 4 }
 0x122   :  { %1800 = vpow2.f32 %v1497_v13 }
 0x12f   :  { %v1801_v16 = vpop.eup %1800 }
 0x130   :  { %v617_v17 = vadd.f32 1.0, %v1801_v16 }
 0x132   :  { %1802 = vrcp.f32 %v617_v17 }
 0x13f   :  { %v1803_v19 = vpop.eup %1802 }
 0x140   :  { %v621_v20 = vmul.f32 %v1803_v19, %v620_v18  ;;  %v628_v23 = vrot.slane %v1803_v19, 2 }
 0x142   :  { %v625_v22 = vadd.f32 %v623_v21, %v621_v20  ;;  %v630_v24 = vsub.f32 1.0, %v628_v23  ;;  %v632_v27 = vmul.f32 0.0, %v628_v23 }
 0x144   :  { %1804 = vtanh.f32 %v625_v22 }
 0x151   :  { %v1805_v25 = vpop.eup %1804 }
 0x152   :  { %v631_v26 = vmul.f32 %v1805_v25, %v630_v24 }
 0x154   :  { %v2151_v29 = vadd.f32 %v632_v27, %v631_v26 }
 0x156   :  { %v636_v30 = vpack.c.bf16 %v2151_v29, %v2151_v29 }
 0x158   :  { %670 = vmatmul.mubr.bf16.vlgmr.msra.gmra.mxu0 %v636_v30  ;;  %1625 = vmatmul.mubr.bf16.vlgmr.msra.gmra.mxu1 %v636_v30  ;;  %v751_v30 = vld [vmem:[#allocation2 + $0xc] sm:$0x3f] }
 0x159   :  { %754 = vmatpush1.bf16.msra.mxu0 %v2012_v33  ;;  %1629 = vmatpush3.bf16.msra.mxu1 %v2023_v38 }
 0x15a   :  { %755 = vmatprep.subr.bf16.mxu0 %v2014_v35  ;;  %1630 = vmatprep.subr.bf16.mxu1 %v1950_v0 }
 0x15b   :  { %785 = vmatprep.mubr.bf16.mxu0 %v1951_v1  ;;  %1644 = vmatprep.mubr.msk.bf16.mxu1 %vm1952_vm0, %v1950_v0 }
 0x15d   :  { %756 = vmatpush1.bf16.msra.mxu0 %v2017_v36  ;;  %1631 = vmatpush3.bf16.msra.mxu1 %v2028_v39 }
 0x15e   :  { %757 = vmatprep.subr.bf16.mxu0 %v2019_v37  ;;  %1632 = vmatprep.subr.bf16.mxu1 %v1950_v0 }
 0x161   :  { %758 = vmatpush1.bf16.msra.mxu0 %v2031_v40  ;;  %1633 = vmatpush3.bf16.msra.mxu1 %v2038_v42 }
 0x162   :  { %759 = vmatprep.subr.bf16.mxu0 %v2035_v41  ;;  %1634 = vmatprep.subr.bf16.mxu1 %v1950_v0 }
 0x165   :  { %760 = vmatpush1.bf16.msra.mxu0 %v2041_v43  ;;  %1635 = vmatpush3.bf16.msra.mxu1 %v2048_v45 }
 0x166   :  { %761 = vmatprep.subr.bf16.mxu0 %v2045_v44  ;;  %1636 = vmatprep.subr.bf16.mxu1 %v1950_v0 }
 0x169   :  { %762 = vmatpush1.bf16.msra.mxu0 %v2051_v46  ;;  %1637 = vmatpush3.bf16.msra.mxu1 %v2058_v48 }
 0x16a   :  { %763 = vmatprep.subr.bf16.mxu0 %v2055_v47  ;;  %1638 = vmatprep.subr.bf16.mxu1 %v1950_v0 }
 0x16d   :  { %764 = vmatpush1.bf16.msra.mxu0 %v2061_v49  ;;  %1639 = vmatpush3.bf16.msra.mxu1 %v2068_v51 }
 0x16e   :  { %765 = vmatprep.subr.bf16.mxu0 %v2065_v50  ;;  %1640 = vmatprep.subr.bf16.mxu1 %v1950_v0 }
 0x171   :  { %766 = vmatpush1.bf16.msra.mxu0 %v2071_v52  ;;  %1641 = vmatpush3.bf16.msra.mxu1 %v2078_v54 }
 0x172   :  { %767 = vmatprep.subr.bf16.mxu0 %v2075_v53  ;;  %1642 = vmatprep.subr.bf16.mxu1 %v1950_v0 }
 0x175   :  { %768 = vmatpush1.bf16.msra.mxu0 %v2081_v55  ;;  %1643 = vmatpush3.bf16.msra.mxu1 %v2086_v56 }
 0x176   :  { %869 = vmatprep.subr.bf16.mxu0 %v2006_v28  ;;  %1648 = vmatprep.subr.bf16.mxu1 %v1950_v0 }
 0x218   :  { %v671_v31 = vpop.f32.mrf.mxu0  ;;  %v712_v32 = vpop.f32.mrf.mxu1 }
 0x219   :  { %v736_v8 = vadd.f32 %v2148_v7, %v712_v32 }
 0x21a   :  { %v673_v34 = vpop.f32.mrf.mxu0  ;;  %v1626_v57 = vpop.f32.mrf.mxu1 }
 0x21b   :  { %v720_v58 = vcombine.low %v671_v31, %v673_v34 }
 0x21c   :  { %v675_v59 = vpop.f32.mrf.mxu0  ;;  %v715_v60 = vpop.f32.mrf.mxu1 }
 0x21d   :  { %v727_v61 = vrot.slane %v720_v58, %v2001_v14 }
 0x21e   :  { %v676_v63 = vpop.f32.mrf.mxu0  ;;  %v1627_v2 = vpop.f32.mrf.mxu1 }
 0x21f   :  { %v729_v3 = vadd.f32 %v727_v61, %v635_v62  ;;  %v855_v63 = vrot.slane %v751_v30, 4 }
 0x221   :  { %v1498_v4 = vmul.f32 -1.442695, %v729_v3 }
 0x223   :  { %1806 = vpow2.f32 %v1498_v4 }
 0x230   :  { %v1807_v5 = vpop.eup %1806 }
 0x231   :  { %v733_v6 = vadd.f32 1.0, %v1807_v5 }
 0x233   :  { %1808 = vrcp.f32 %v733_v6 }
 0x240   :  { %v1809_v9 = vpop.eup %1808 }
 0x241   :  { %v737_v10 = vmul.f32 %v1809_v9, %v736_v8  ;;  %v744_v13 = vrot.slane %v1809_v9, 2 }
 0x243   :  { %v741_v12 = vadd.f32 %v739_v11, %v737_v10  ;;  %v746_v15 = vsub.f32 1.0, %v744_v13  ;;  %v748_v18 = vmul.f32 %v744_v13, %v2151_v29 }
 0x245   :  { %1810 = vtanh.f32 %v741_v12 }
 0x252   :  { %v1811_v16 = vpop.eup %1810 }
 0x253   :  { %v747_v17 = vmul.f32 %v1811_v16, %v746_v15 }
 0x255   :  { %v2193_v19 = vadd.f32 %v748_v18, %v747_v17 }
 0x257   :  { %v752_v20 = vpack.c.bf16 %v2193_v19, %v2193_v19 }
 0x259   :  { %786 = vmatmul.mubr.bf16.vlgmr.msra.gmra.mxu0 %v752_v20  ;;  %1645 = vmatmul.mubr.bf16.vlgmr.msra.gmra.mxu1 %v752_v20  ;;  %v867_v20 = vld [vmem:[#allocation2 + $0x12] sm:$0x3f] }
 0x25a   :  { %870 = vmatpush1.bf16.msra.mxu0 %v2012_v33  ;;  %1649 = vmatpush3.bf16.msra.mxu1 %v2023_v38 }
 0x25b   :  { %871 = vmatprep.subr.bf16.mxu0 %v2014_v35  ;;  %1650 = vmatprep.subr.bf16.mxu1 %v1950_v0 }
 0x25c   :  { %901 = vmatprep.mubr.bf16.mxu0 %v1951_v1  ;;  %1664 = vmatprep.mubr.msk.bf16.mxu1 %vm1952_vm0, %v1950_v0 }
 0x25e   :  { %872 = vmatpush1.bf16.msra.mxu0 %v2017_v36  ;;  %1651 = vmatpush3.bf16.msra.mxu1 %v2028_v39 }
 0x25f   :  { %873 = vmatprep.subr.bf16.mxu0 %v2019_v37  ;;  %1652 = vmatprep.subr.bf16.mxu1 %v1950_v0 }
 0x262   :  { %874 = vmatpush1.bf16.msra.mxu0 %v2031_v40  ;;  %1653 = vmatpush3.bf16.msra.mxu1 %v2038_v42 }
 0x263   :  { %875 = vmatprep.subr.bf16.mxu0 %v2035_v41  ;;  %1654 = vmatprep.subr.bf16.mxu1 %v1950_v0 }
 0x266   :  { %876 = vmatpush1.bf16.msra.mxu0 %v2041_v43  ;;  %1655 = vmatpush3.bf16.msra.mxu1 %v2048_v45 }
 0x267   :  { %877 = vmatprep.subr.bf16.mxu0 %v2045_v44  ;;  %1656 = vmatprep.subr.bf16.mxu1 %v1950_v0 }
 0x26a   :  { %878 = vmatpush1.bf16.msra.mxu0 %v2051_v46  ;;  %1657 = vmatpush3.bf16.msra.mxu1 %v2058_v48 }
 0x26b   :  { %879 = vmatprep.subr.bf16.mxu0 %v2055_v47  ;;  %1658 = vmatprep.subr.bf16.mxu1 %v1950_v0 }
 0x26e   :  { %880 = vmatpush1.bf16.msra.mxu0 %v2061_v49  ;;  %1659 = vmatpush3.bf16.msra.mxu1 %v2068_v51 }
 0x26f   :  { %881 = vmatprep.subr.bf16.mxu0 %v2065_v50  ;;  %1660 = vmatprep.subr.bf16.mxu1 %v1950_v0 }
 0x272   :  { %882 = vmatpush1.bf16.msra.mxu0 %v2071_v52  ;;  %1661 = vmatpush3.bf16.msra.mxu1 %v2078_v54 }
 0x273   :  { %883 = vmatprep.subr.bf16.mxu0 %v2075_v53  ;;  %1662 = vmatprep.subr.bf16.mxu1 %v1950_v0 }
 0x276   :  { %884 = vmatpush1.bf16.msra.mxu0 %v2081_v55  ;;  %1663 = vmatpush3.bf16.msra.mxu1 %v2086_v56 }
 0x277   :  { %985 = vmatprep.subr.bf16.mxu0 %v2006_v28  ;;  %1668 = vmatprep.subr.bf16.mxu1 %v1950_v0 }
 0x319   :  { %v787_v21 = vpop.f32.mrf.mxu0  ;;  %v828_v22 = vpop.f32.mrf.mxu1 }
 0x31a   :  { %v852_v60 = vadd.f32 %v2148_v7, %v828_v22 }
 0x31b   :  { %v789_v23 = vpop.f32.mrf.mxu0  ;;  %v1646_v24 = vpop.f32.mrf.mxu1 }
 0x31c   :  { %v836_v25 = vcombine.low %v787_v21, %v789_v23 }
 0x31d   :  { %v791_v26 = vpop.f32.mrf.mxu0  ;;  %v831_v27 = vpop.f32.mrf.mxu1 }
 0x31e   :  { %v843_v29 = vrot.slane %v836_v25, %v2001_v14 }
 0x31f   :  { %v792_v31 = vpop.f32.mrf.mxu0  ;;  %v1647_v32 = vpop.f32.mrf.mxu1 }
 0x320   :  { %v845_v34 = vadd.f32 %v843_v29, %v751_v30  ;;  %v971_v31 = vrot.slane %v867_v20, 4 }
 0x322   :  { %v1499_v57 = vmul.f32 -1.442695, %v845_v34 }
 0x324   :  { %1812 = vpow2.f32 %v1499_v57 }
 0x331   :  { %v1813_v58 = vpop.eup %1812 }
 0x332   :  { %v849_v59 = vadd.f32 1.0, %v1813_v58 }
 0x334   :  { %1814 = vrcp.f32 %v849_v59 }
 0x341   :  { %v1815_v61 = vpop.eup %1814 }
 0x342   :  { %v853_v62 = vmul.f32 %v1815_v61, %v852_v60  ;;  %v860_v3 = vrot.slane %v1815_v61, 2 }
 0x344   :  { %v857_v2 = vadd.f32 %v855_v63, %v853_v62  ;;  %v862_v4 = vsub.f32 1.0, %v860_v3  ;;  %v864_v8 = vmul.f32 %v860_v3, %v2193_v19 }
 0x346   :  { %1816 = vtanh.f32 %v857_v2 }
 0x353   :  { %v1817_v5 = vpop.eup %1816 }
 0x354   :  { %v863_v6 = vmul.f32 %v1817_v5, %v862_v4 }
 0x356   :  { %v2235_v9 = vadd.f32 %v864_v8, %v863_v6 }
 0x358   :  { %v868_v10 = vpack.c.bf16 %v2235_v9, %v2235_v9 }
 0x35a   :  { %902 = vmatmul.mubr.bf16.vlgmr.msra.gmra.mxu0 %v868_v10  ;;  %1665 = vmatmul.mubr.bf16.vlgmr.msra.gmra.mxu1 %v868_v10  ;;  %v983_v10 = vld [vmem:[#allocation2 + $0x18] sm:$0x3f] }
 0x35b   :  { %986 = vmatpush1.bf16.msra.mxu0 %v2012_v33  ;;  %1669 = vmatpush3.bf16.msra.mxu1 %v2023_v38 }
 0x35c   :  { %987 = vmatprep.subr.bf16.mxu0 %v2014_v35  ;;  %1670 = vmatprep.subr.bf16.mxu1 %v1950_v0 }
 0x35d   :  { %1017 = vmatprep.mubr.bf16.mxu0 %v1951_v1  ;;  %1684 = vmatprep.mubr.msk.bf16.mxu1 %vm1952_vm0, %v1950_v0 }
 0x35f   :  { %988 = vmatpush1.bf16.msra.mxu0 %v2017_v36  ;;  %1671 = vmatpush3.bf16.msra.mxu1 %v2028_v39 }
 0x360   :  { %989 = vmatprep.subr.bf16.mxu0 %v2019_v37  ;;  %1672 = vmatprep.subr.bf16.mxu1 %v1950_v0 }
 0x363   :  { %990 = vmatpush1.bf16.msra.mxu0 %v2031_v40  ;;  %1673 = vmatpush3.bf16.msra.mxu1 %v2038_v42 }
 0x364   :  { %991 = vmatprep.subr.bf16.mxu0 %v2035_v41  ;;  %1674 = vmatprep.subr.bf16.mxu1 %v1950_v0 }
 0x367   :  { %992 = vmatpush1.bf16.msra.mxu0 %v2041_v43  ;;  %1675 = vmatpush3.bf16.msra.mxu1 %v2048_v45 }
 0x368   :  { %993 = vmatprep.subr.bf16.mxu0 %v2045_v44  ;;  %1676 = vmatprep.subr.bf16.mxu1 %v1950_v0 }
 0x36b   :  { %994 = vmatpush1.bf16.msra.mxu0 %v2051_v46  ;;  %1677 = vmatpush3.bf16.msra.mxu1 %v2058_v48 }
 0x36c   :  { %995 = vmatprep.subr.bf16.mxu0 %v2055_v47  ;;  %1678 = vmatprep.subr.bf16.mxu1 %v1950_v0 }
 0x36f   :  { %996 = vmatpush1.bf16.msra.mxu0 %v2061_v49  ;;  %1679 = vmatpush3.bf16.msra.mxu1 %v2068_v51 }
 0x370   :  { %997 = vmatprep.subr.bf16.mxu0 %v2065_v50  ;;  %1680 = vmatprep.subr.bf16.mxu1 %v1950_v0 }
 0x373   :  { %998 = vmatpush1.bf16.msra.mxu0 %v2071_v52  ;;  %1681 = vmatpush3.bf16.msra.mxu1 %v2078_v54 }
 0x374   :  { %999 = vmatprep.subr.bf16.mxu0 %v2075_v53  ;;  %1682 = vmatprep.subr.bf16.mxu1 %v1950_v0 }
 0x377   :  { %1000 = vmatpush1.bf16.msra.mxu0 %v2081_v55  ;;  %1683 = vmatpush3.bf16.msra.mxu1 %v2086_v56 }
 0x378   :  { %1101 = vmatprep.subr.bf16.mxu0 %v2006_v28  ;;  %1688 = vmatprep.subr.bf16.mxu1 %v1950_v0 }
 0x41a   :  { %v903_v11 = vpop.f32.mrf.mxu0  ;;  %v944_v12 = vpop.f32.mrf.mxu1 }
 0x41b   :  { %v968_v27 = vadd.f32 %v2148_v7, %v944_v12 }
 0x41c   :  { %v905_v13 = vpop.f32.mrf.mxu0  ;;  %v1666_v15 = vpop.f32.mrf.mxu1 }
 0x41d   :  { %v952_v16 = vcombine.low %v903_v11, %v905_v13 }
 0x41e   :  { %v907_v17 = vpop.f32.mrf.mxu0  ;;  %v947_v18 = vpop.f32.mrf.mxu1 }
 0x41f   :  { %v959_v19 = vrot.slane %v952_v16, %v2001_v14 }
 0x420   :  { %v908_v21 = vpop.f32.mrf.mxu0  ;;  %v1667_v22 = vpop.f32.mrf.mxu1 }
 0x421   :  { %v961_v23 = vadd.f32 %v959_v19, %v867_v20  ;;  %v1087_v20 = vrot.slane %v983_v10, 4 }
 0x423   :  { %v1500_v24 = vmul.f32 -1.442695, %v961_v23 }
 0x425   :  { %1818 = vpow2.f32 %v1500_v24 }
 0x432   :  { %v1819_v25 = vpop.eup %1818 }
 0x433   :  { %v965_v26 = vadd.f32 1.0, %v1819_v25 }
 0x435   :  { %1820 = vrcp.f32 %v965_v26 }
 0x442   :  { %v1821_v29 = vpop.eup %1820 }
 0x443   :  { %v969_v30 = vmul.f32 %v1821_v29, %v968_v27  ;;  %v976_v34 = vrot.slane %v1821_v29, 2 }
 0x445   :  { %v973_v32 = vadd.f32 %v971_v31, %v969_v30  ;;  %v978_v57 = vsub.f32 1.0, %v976_v34  ;;  %v980_v60 = vmul.f32 %v976_v34, %v2235_v9  ;;  %v1099_v31 = vld [vmem:[#allocation2 + $0x1e] sm:$0x3f] }
 0x447   :  { %1822 = vtanh.f32 %v973_v32 }
 0x454   :  { %v1823_v58 = vpop.eup %1822 }
 0x455   :  { %v979_v59 = vmul.f32 %v1823_v58, %v978_v57 }
 0x457   :  { %v2277_v61 = vadd.f32 %v980_v60, %v979_v59 }
 0x459   :  { %v984_v62 = vpack.c.bf16 %v2277_v61, %v2277_v61 }
 0x45b   :  { %1018 = vmatmul.mubr.bf16.vlgmr.msra.gmra.mxu0 %v984_v62  ;;  %1685 = vmatmul.mubr.bf16.vlgmr.msra.gmra.mxu1 %v984_v62 }
 0x45c   :  { %1102 = vmatpush1.bf16.msra.mxu0 %v2012_v33  ;;  %1689 = vmatpush3.bf16.msra.mxu1 %v2023_v38 }
 0x45d   :  { %1103 = vmatprep.subr.bf16.mxu0 %v2014_v35  ;;  %1690 = vmatprep.subr.bf16.mxu1 %v1950_v0 }
 0x45e   :  { %1133 = vmatprep.mubr.bf16.mxu0 %v1951_v1  ;;  %1704 = vmatprep.mubr.msk.bf16.mxu1 %vm1952_vm0, %v1950_v0 }
 0x460   :  { %1104 = vmatpush1.bf16.msra.mxu0 %v2017_v36  ;;  %1691 = vmatpush3.bf16.msra.mxu1 %v2028_v39 }
 0x461   :  { %1105 = vmatprep.subr.bf16.mxu0 %v2019_v37  ;;  %1692 = vmatprep.subr.bf16.mxu1 %v1950_v0 }
 0x464   :  { %1106 = vmatpush1.bf16.msra.mxu0 %v2031_v40  ;;  %1693 = vmatpush3.bf16.msra.mxu1 %v2038_v42 }
 0x465   :  { %1107 = vmatprep.subr.bf16.mxu0 %v2035_v41  ;;  %1694 = vmatprep.subr.bf16.mxu1 %v1950_v0 }
 0x468   :  { %1108 = vmatpush1.bf16.msra.mxu0 %v2041_v43  ;;  %1695 = vmatpush3.bf16.msra.mxu1 %v2048_v45 }
 0x469   :  { %1109 = vmatprep.subr.bf16.mxu0 %v2045_v44  ;;  %1696 = vmatprep.subr.bf16.mxu1 %v1950_v0 }
 0x46c   :  { %1110 = vmatpush1.bf16.msra.mxu0 %v2051_v46  ;;  %1697 = vmatpush3.bf16.msra.mxu1 %v2058_v48 }
 0x46d   :  { %1111 = vmatprep.subr.bf16.mxu0 %v2055_v47  ;;  %1698 = vmatprep.subr.bf16.mxu1 %v1950_v0 }
 0x470   :  { %1112 = vmatpush1.bf16.msra.mxu0 %v2061_v49  ;;  %1699 = vmatpush3.bf16.msra.mxu1 %v2068_v51 }
 0x471   :  { %1113 = vmatprep.subr.bf16.mxu0 %v2065_v50  ;;  %1700 = vmatprep.subr.bf16.mxu1 %v1950_v0 }
 0x474   :  { %1114 = vmatpush1.bf16.msra.mxu0 %v2071_v52  ;;  %1701 = vmatpush3.bf16.msra.mxu1 %v2078_v54 }
 0x475   :  { %1115 = vmatprep.subr.bf16.mxu0 %v2075_v53  ;;  %1702 = vmatprep.subr.bf16.mxu1 %v1950_v0 }
 0x478   :  { %1116 = vmatpush1.bf16.msra.mxu0 %v2081_v55  ;;  %1703 = vmatpush3.bf16.msra.mxu1 %v2086_v56 }
 0x479   :  { %1217 = vmatprep.subr.bf16.mxu0 %v2006_v28  ;;  %1708 = vmatprep.subr.bf16.mxu1 %v1950_v0 }
 0x51b   :  { %v1019_v63 = vpop.f32.mrf.mxu0  ;;  %v1060_v2 = vpop.f32.mrf.mxu1 }
 0x51c   :  { %v1084_v28 = vadd.f32 %v2148_v7, %v1060_v2  ;;  %v1203_v2 = vrot.slane %v1099_v31, 4 }
 0x51d   :  { %v1021_v3 = vpop.f32.mrf.mxu0  ;;  %v1686_v4 = vpop.f32.mrf.mxu1 }
 0x51e   :  { %v1068_v5 = vcombine.low %v1019_v63, %v1021_v3 }
 0x51f   :  { %v1023_v6 = vpop.f32.mrf.mxu0  ;;  %v1063_v8 = vpop.f32.mrf.mxu1 }
 0x520   :  { %v1075_v9 = vrot.slane %v1068_v5, %v2001_v14 }
 0x521   :  { %v1024_v11 = vpop.f32.mrf.mxu0  ;;  %v1687_v12 = vpop.f32.mrf.mxu1 }
 0x522   :  { %v1077_v13 = vadd.f32 %v1075_v9, %v983_v10  ;;  %v1849_v12 = vld [vmem:[#allocation8 + $0xa8] ss:$12 sps:$4 sm:$0xff]  }
 0x524   :  { %v1501_v15 = vmul.f32 -1.442695, %v1077_v13  ;;  %v1850_v13 = vld [vmem:[#allocation8 + $0xb0] ss:$12 sps:$4 sm:$0xff]  }
 0x526   :  { %1824 = vpow2.f32 %v1501_v15  ;;  %v1851_v15 = vld [vmem:[#allocation8 + $0x94] ss:$12 sps:$4 sm:$0xff]  }
 0x533   :  { %v1825_v16 = vpop.eup %1824 }
 0x534   :  { %v1081_v17 = vadd.f32 1.0, %v1825_v16  ;;  %v1852_v16 = vld [vmem:[#allocation8 + $0x90] ss:$12 sps:$4 sm:$0xff]  }
 0x536   :  { %1826 = vrcp.f32 %v1081_v17  ;;  %v1853_v17 = vld [vmem:[#allocation8 + $0x98] ss:$12 sps:$4 sm:$0xff]  }
 0x543   :  { %v1827_v18 = vpop.eup %1826 }
 0x544   :  { %v1085_v19 = vmul.f32 %v1827_v18, %v1084_v28  ;;  %v1092_v22 = vrot.slane %v1827_v18, 2  ;;  %v1854_v28 = vld [vmem:[#allocation8 + $0x7c] ss:$12 sps:$4 sm:$0xff]   ;;  %v1855_v18 = vld [vmem:[#allocation8 + $0x78] ss:$12 sps:$4 sm:$0xff]  }
 0x546   :  { %v1089_v21 = vadd.f32 %v1087_v20, %v1085_v19  ;;  %v1094_v23 = vsub.f32 1.0, %v1092_v22  ;;  %v1096_v26 = vmul.f32 %v1092_v22, %v2277_v61  ;;  %v1856_v19 = vld [vmem:[#allocation8 + $0x64] ss:$12 sps:$4 sm:$0xff]  }
 0x548   :  { %1828 = vtanh.f32 %v1089_v21 }
 0x555   :  { %v1829_v24 = vpop.eup %1828 }
 0x556   :  { %v1095_v25 = vmul.f32 %v1829_v24, %v1094_v23 }
 0x558   :  { %v2319_v27 = vadd.f32 %v1096_v26, %v1095_v25 }
 0x55a   :  { %v1100_v29 = vpack.c.bf16 %v2319_v27, %v2319_v27 }
 0x55c   :  { %1134 = vmatmul.mubr.bf16.vlgmr.msra.gmra.mxu0 %v1100_v29  ;;  %1705 = vmatmul.mubr.bf16.vlgmr.msra.gmra.mxu1 %v1100_v29 }
 0x55d   :  { %1218 = vmatpush1.bf16.msra.mxu0 %v2012_v33  ;;  %1709 = vmatpush3.bf16.msra.mxu1 %v2023_v38  ;;  %v1848_v33 = vld [vmem:[#allocation8 + $0xac] ss:$12 sps:$4 sm:$0xff]  }
 0x55e   :  { %1219 = vmatprep.subr.bf16.mxu0 %v2014_v35  ;;  %1710 = vmatprep.subr.bf16.mxu1 %v1950_v0 }
 0x55f   :  { %1249 = vmatprep.mubr.bf16.mxu0 %v1951_v1  ;;  %1724 = vmatprep.mubr.msk.bf16.mxu1 %vm1952_vm0, %v1950_v0 }
 0x561   :  { %1220 = vmatpush1.bf16.msra.mxu0 %v2017_v36  ;;  %1711 = vmatpush3.bf16.msra.mxu1 %v2028_v39 }
 0x562   :  { %1221 = vmatprep.subr.bf16.mxu0 %v2019_v37  ;;  %1712 = vmatprep.subr.bf16.mxu1 %v1950_v0 }
 0x565   :  { %1222 = vmatpush1.bf16.msra.mxu0 %v2031_v40  ;;  %1713 = vmatpush3.bf16.msra.mxu1 %v2038_v42 }
 0x566   :  { %1223 = vmatprep.subr.bf16.mxu0 %v2035_v41  ;;  %1714 = vmatprep.subr.bf16.mxu1 %v1950_v0 }
 0x569   :  { %1224 = vmatpush1.bf16.msra.mxu0 %v2041_v43  ;;  %1715 = vmatpush3.bf16.msra.mxu1 %v2048_v45 }
 0x56a   :  { %1225 = vmatprep.subr.bf16.mxu0 %v2045_v44  ;;  %1716 = vmatprep.subr.bf16.mxu1 %v1950_v0 }
 0x56d   :  { %1226 = vmatpush1.bf16.msra.mxu0 %v2051_v46  ;;  %1717 = vmatpush3.bf16.msra.mxu1 %v2058_v48 }
 0x56e   :  { %1227 = vmatprep.subr.bf16.mxu0 %v2055_v47  ;;  %1718 = vmatprep.subr.bf16.mxu1 %v1950_v0 }
 0x571   :  { %1228 = vmatpush1.bf16.msra.mxu0 %v2061_v49  ;;  %1719 = vmatpush3.bf16.msra.mxu1 %v2068_v51 }
 0x572   :  { %1229 = vmatprep.subr.bf16.mxu0 %v2065_v50  ;;  %1720 = vmatprep.subr.bf16.mxu1 %v1950_v0 }
 0x575   :  { %1230 = vmatpush1.bf16.msra.mxu0 %v2071_v52  ;;  %1721 = vmatpush3.bf16.msra.mxu1 %v2078_v54 }
 0x576   :  { %1231 = vmatprep.subr.bf16.mxu0 %v2075_v53  ;;  %1722 = vmatprep.subr.bf16.mxu1 %v1950_v0 }
 0x579   :  { %1232 = vmatpush1.bf16.msra.mxu0 %v2081_v55  ;;  %1723 = vmatpush3.bf16.msra.mxu1 %v2086_v56 }
 0x57a   :  { %1333 = vmatprep.subr.bf16.mxu0 %v1848_v33  ;;  %1728 = vmatprep.subr.bf16.mxu1 %v1950_v0 }
 0x61c   :  { %v1135_v35 = vpop.f32.mrf.mxu0  ;;  %v1176_v36 = vpop.f32.mrf.mxu1 }
 0x61d   :  { %v1200_v61 = vadd.f32 %v2148_v7, %v1176_v36 }
 0x61e   :  { %v1137_v37 = vpop.f32.mrf.mxu0  ;;  %v1706_v38 = vpop.f32.mrf.mxu1 }
 0x61f   :  { %v1184_v39 = vcombine.low %v1135_v35, %v1137_v37 }
 0x620   :  { %v1139_v40 = vpop.f32.mrf.mxu0  ;;  %v1179_v41 = vpop.f32.mrf.mxu1 }
 0x621   :  { %v1191_v30 = vrot.slane %v1184_v39, %v2001_v14 }
 0x622   :  { %v1140_v32 = vpop.f32.mrf.mxu0  ;;  %v1707_v34 = vpop.f32.mrf.mxu1 }
 0x623   :  { %v1193_v57 = vadd.f32 %v1191_v30, %v1099_v31  ;;  %v1331_v31 = vld [vmem:[#allocation2 + $0x2a] sm:$0x3f] }
 0x625   :  { %v1502_v58 = vmul.f32 -1.442695, %v1193_v57 }
 0x627   :  { %1830 = vpow2.f32 %v1502_v58 }
 0x634   :  { %v1831_v59 = vpop.eup %1830 }
 0x635   :  { %v1197_v60 = vadd.f32 1.0, %v1831_v59 }
 0x637   :  { %1832 = vrcp.f32 %v1197_v60 }
 0x644   :  { %v1833_v62 = vpop.eup %1832 }
 0x645   :  { %v1201_v63 = vmul.f32 %v1833_v62, %v1200_v61  ;;  %v1208_v4 = vrot.slane %v1833_v62, 2 }
 0x647   :  { %v1205_v3 = vadd.f32 %v1203_v2, %v1201_v63  ;;  %v1210_v5 = vsub.f32 1.0, %v1208_v4  ;;  %v1212_v9 = vmul.f32 %v1208_v4, %v2319_v27  ;;  %v1435_v2 = vrot.slane %v1331_v31, 4 }
 0x649   :  { %1834 = vtanh.f32 %v1205_v3 }
 0x656   :  { %v1835_v6 = vpop.eup %1834 }
 0x657   :  { %v1211_v8 = vmul.f32 %v1835_v6, %v1210_v5 }
 0x659   :  { %v2360_v10 = vadd.f32 %v1212_v9, %v1211_v8 }
 0x65b   :  { %v1216_v11 = vpack.c.bf16 %v2360_v10, %v2360_v10 }
 0x65d   :  { %1250 = vmatmul.mubr.bf16.vlgmr.msra.gmra.mxu0 %v1216_v11  ;;  %1725 = vmatmul.mubr.bf16.vlgmr.msra.gmra.mxu1 %v1216_v11 }
 0x65e   :  { %1334 = vmatpush1.bf16.msra.mxu0 %v1849_v12  ;;  %1729 = vmatpush3.bf16.msra.mxu1 %v1850_v13 }
 0x65f   :  { %1335 = vmatprep.subr.bf16.mxu0 %v1851_v15  ;;  %1730 = vmatprep.subr.bf16.mxu1 %v1950_v0 }
 0x660   :  { %1365 = vmatprep.mubr.bf16.mxu0 %v1951_v1  ;;  %1744 = vmatprep.mubr.msk.bf16.mxu1 %vm1952_vm0, %v1950_v0 }
 0x662   :  { %1336 = vmatpush1.bf16.msra.mxu0 %v1852_v16  ;;  %1731 = vmatpush3.bf16.msra.mxu1 %v1853_v17 }
 0x663   :  { %1337 = vmatprep.subr.bf16.mxu0 %v1854_v28  ;;  %1732 = vmatprep.subr.bf16.mxu1 %v1950_v0 }
 0x666   :  { %1338 = vmatpush1.bf16.msra.mxu0 %v1855_v18  ;;  %1733 = vmatpush3.bf16.msra.mxu1 %v2038_v42 }
 0x667   :  { %1339 = vmatprep.subr.bf16.mxu0 %v1856_v19  ;;  %1734 = vmatprep.subr.bf16.mxu1 %v1950_v0 }
 0x66a   :  { %1340 = vmatpush1.bf16.msra.mxu0 %v2041_v43  ;;  %1735 = vmatpush3.bf16.msra.mxu1 %v2048_v45 }
 0x66b   :  { %1341 = vmatprep.subr.bf16.mxu0 %v2045_v44  ;;  %1736 = vmatprep.subr.bf16.mxu1 %v1950_v0 }
 0x66e   :  { %1342 = vmatpush1.bf16.msra.mxu0 %v2051_v46  ;;  %1737 = vmatpush3.bf16.msra.mxu1 %v2058_v48 }
 0x66f   :  { %1343 = vmatprep.subr.bf16.mxu0 %v2055_v47  ;;  %1738 = vmatprep.subr.bf16.mxu1 %v1950_v0 }
 0x672   :  { %1344 = vmatpush1.bf16.msra.mxu0 %v2061_v49  ;;  %1739 = vmatpush3.bf16.msra.mxu1 %v2068_v51  ;;  %v1215_v49 = vld [vmem:[#allocation2 + $0x24] sm:$0x3f] }
 0x673   :  { %1345 = vmatprep.subr.bf16.mxu0 %v2065_v50  ;;  %1740 = vmatprep.subr.bf16.mxu1 %v1950_v0  ;;  %v1319_v21 = vrot.slane %v1215_v49, 4 }
 0x676   :  { %1346 = vmatpush1.bf16.msra.mxu0 %v2071_v52  ;;  %1741 = vmatpush3.bf16.msra.mxu1 %v2078_v54 }
 0x677   :  { %1347 = vmatprep.subr.bf16.mxu0 %v2075_v53  ;;  %1742 = vmatprep.subr.bf16.mxu1 %v1950_v0 }
 0x67a   :  { %1348 = vmatpush1.bf16.msra.mxu0 %v2081_v55  ;;  %1743 = vmatpush3.bf16.msra.mxu1 %v2086_v56 }
 0x71d   :  { %v1251_v1 = vpop.f32.mrf.mxu0  ;;  %v1292_v42 = vpop.f32.mrf.mxu1 }
 0x71e   :  { %v1316_v55 = vadd.f32 %v2148_v7, %v1292_v42 }
 0x71f   :  { %v1253_v43 = vpop.f32.mrf.mxu0  ;;  %v1726_v44 = vpop.f32.mrf.mxu1 }
 0x720   :  { %v1300_v45 = vcombine.low %v1251_v1, %v1253_v43 }
 0x721   :  { %v1255_v46 = vpop.f32.mrf.mxu0  ;;  %v1295_v47 = vpop.f32.mrf.mxu1 }
 0x722   :  { %v1307_v48 = vrot.slane %v1300_v45, %v2001_v14 }
 0x723   :  { %v1256_v50 = vpop.f32.mrf.mxu0  ;;  %v1727_v51 = vpop.f32.mrf.mxu1 }
 0x724   :  { %v1309_v52 = vadd.f32 %v1307_v48, %v1215_v49 }
 0x726   :  { %v1503_v53 = vmul.f32 -1.442695, %v1309_v52 }
 0x728   :  { %1836 = vpow2.f32 %v1503_v53 }
 0x735   :  { %v1837_v0 = vpop.eup %1836 }
 0x736   :  { %v1313_v54 = vadd.f32 1.0, %v1837_v0 }
 0x738   :  { %1838 = vrcp.f32 %v1313_v54 }
 0x745   :  { %v1839_v56 = vpop.eup %1838 }
 0x746   :  { %v1317_v20 = vmul.f32 %v1839_v56, %v1316_v55  ;;  %v1324_v23 = vrot.slane %v1839_v56, 2 }
 0x748   :  { %v1321_v22 = vadd.f32 %v1319_v21, %v1317_v20  ;;  %v1326_v24 = vsub.f32 1.0, %v1324_v23  ;;  %v1328_v27 = vmul.f32 %v1324_v23, %v2360_v10 }
 0x74a   :  { %1840 = vtanh.f32 %v1321_v22 }
 0x757   :  { %v1841_v25 = vpop.eup %1840 }
 0x758   :  { %v1327_v26 = vmul.f32 %v1841_v25, %v1326_v24 }
 0x75a   :  { %v1329_v29 = vadd.f32 %v1328_v27, %v1327_v26 }
 0x75c   :  { %v1332_v33 = vpack.c.bf16 %v1329_v29, %v1329_v29 }
 0x75e   :  { %1366 = vmatmul.mubr.bf16.vlgmr.msra.gmra.mxu0 %v1332_v33  ;;  %1745 = vmatmul.mubr.bf16.vlgmr.msra.gmra.mxu1 %v1332_v33 }
 0x81e   :  { %v1367_v35 = vpop.f32.mrf.mxu0  ;;  %v1408_v36 = vpop.f32.mrf.mxu1 }
 0x81f   :  { %v1432_v61 = vadd.f32 %v2148_v7, %v1408_v36 }
 0x820   :  { %v1369_v37 = vpop.f32.mrf.mxu0  ;;  %v1746_v38 = vpop.f32.mrf.mxu1 }
 0x821   :  { %v1416_v39 = vcombine.low %v1367_v35, %v1369_v37 }
 0x822   :  { %v1371_v40 = vpop.f32.mrf.mxu0  ;;  %v1411_v41 = vpop.f32.mrf.mxu1 }
 0x823   :  { %v1423_v30 = vrot.slane %v1416_v39, %v2001_v14 }
 0x824   :  { %v1372_v32 = vpop.f32.mrf.mxu0  ;;  %v1747_v34 = vpop.f32.mrf.mxu1 }
 0x825   :  { %v1425_v57 = vadd.f32 %v1423_v30, %v1331_v31 }
 0x827   :  { %v1504_v58 = vmul.f32 -1.442695, %v1425_v57 }
 0x829   :  { %1842 = vpow2.f32 %v1504_v58 }
 0x836   :  { %v1843_v59 = vpop.eup %1842 }
 0x837   :  { %v1429_v60 = vadd.f32 1.0, %v1843_v59 }
 0x839   :  { %1844 = vrcp.f32 %v1429_v60 }
 0x846   :  { %v1845_v62 = vpop.eup %1844 }
 0x847   :  { %v1433_v63 = vmul.f32 %v1845_v62, %v1432_v61  ;;  %v1440_v4 = vrot.slane %v1845_v62, 2 }
 0x849   :  { %v1437_v3 = vadd.f32 %v1435_v2, %v1433_v63  ;;  %v1442_v5 = vsub.f32 1.0, %v1440_v4  ;;  %v1444_v8 = vmul.f32 %v1440_v4, %v1329_v29 }
 0x84b   :  { %1846 = vtanh.f32 %v1437_v3 }
 0x858   :  { %v1847_v6 = vpop.eup %1846 }
 0x859   :  { %v1443_v14 = vmul.f32 %v1847_v6, %v1442_v5 }
 0x85b   :  { %v1445_v9 = vadd.f32 %v1444_v8, %v1443_v14 }
 0x85d   :  { %1447 = vst.msk [vmem:[#allocation9] sm:$0x3] %vm1446_vm2, %v1445_v9 }
 0x85e   :  { %1928 = shalt.err (!%p1925_p5)
}
 0x85f   :  { %1457 = dma.vmem_to_hbm [thread:$0]  %s1455_s12, 32, %s2402_s5, [#allocation5]  }
 0x860   :  { %1941 = dma.done.wait [#allocation5], 32  }
 0x861   :  { %1942 = vsyncadd [#allocation5], 4294967264 }
 0x862   :  { %1461 = vsyncpa [#allocation4], 1 }
 0x863   :  { %1462 = vsyncpa [#allocation7], 1 }
 0x864   :  { %1463 = vsyncpa [#allocation5], 1 }

</bundles_post_ra>
